<compile_context>
chip_gen: v6e
topology: v6e:2x2x1
jax: 0.10.0
libtpu: 0.0.40
codegen_flags: <defaults>
</compile_context>

<pallas_src>
import math

import jax
import jax.numpy as jnp
import numpy as np
from jax.experimental import pallas as pl
from jax.experimental.pallas import tpu as pltpu

# ---- model hyperparameters (small, consistent with the module) ----
B = 2          # batch
S = 8          # sequence length
D_MODEL = 32   # d_model
N_HEADS = 4    # n_heads
D_K = D_MODEL // N_HEADS
D_FF = 64      # d_ff
INV_SCALE = 1.0 / math.sqrt(D_K)
LN_EPS = 1e-6
ROWS = B * S   # folded (batch * seq) rows


def _layer_norm(x, gamma, beta):
    # x: (ROWS, D); gamma/beta: (1, D)
    mean = jnp.mean(x, axis=-1, keepdims=True)
    var = jnp.mean((x - mean) ** 2, axis=-1, keepdims=True)
    return (x - mean) * jax.lax.rsqrt(var + LN_EPS) * gamma + beta


def encoder_layer_kernel(
    x_ref, mask_ref,
    wqkv_ref, wo_ref, bo_ref,
    w1_ref, b1_ref, w2_ref, b2_ref,
    ln1g_ref, ln1b_ref, ln2g_ref, ln2b_ref,
    o_ref,
    attn_scratch,
):
    x = x_ref[...]          # (B*S, D)  batch-major folded rows
    mask = mask_ref[...]    # (B, S)    float: 1.0 = keep, 0.0 = masked

    # ---- fused QKV projection (weights pre-transposed & concatenated) ----
    qkv = jnp.dot(x, wqkv_ref[...], preferred_element_type=jnp.float32)  # (B*S, 3D)
    q = qkv[:, 0:D_MODEL]
    k = qkv[:, D_MODEL:2 * D_MODEL]
    v = qkv[:, 2 * D_MODEL:3 * D_MODEL]

    neg_inf = jnp.float32(-jnp.inf)
    # q @ k.T via dot_general contracting the last dim of both operands
    # (no explicit in-kernel transpose of K).
    dnums = (((1,), (1,)), ((), ()))

    # Per-(batch, head) attention; head outputs are written straight into a
    # preallocated (B*S, D) VMEM scratch slab (no lane-axis concatenate).
    for b in range(B):
        r0, r1 = b * S, (b + 1) * S
        mrow = mask[b:b + 1, :]                              # (1, S) broadcasts over queries
        for h in range(N_HEADS):
            c0, c1 = h * D_K, (h + 1) * D_K
            qh = q[r0:r1, c0:c1]                             # (S, d_k)
            kh = k[r0:r1, c0:c1]                             # (S, d_k)
            vh = v[r0:r1, c0:c1]                             # (S, d_k)
            score = jax.lax.dot_general(
                qh, kh, dnums, preferred_element_type=jnp.float32) * INV_SCALE  # (S, S)
            score = jnp.where(mrow > 0, score, neg_inf)      # masked_fill(mask==False, -inf)
            m = jnp.max(score, axis=-1, keepdims=True)
            e = jnp.exp(score - m)
            denom = jnp.sum(e, axis=-1, keepdims=True)
            probs = e * pl.reciprocal(denom, approx=True)    # softmax (EUP reciprocal)
            attn_scratch[r0:r1, c0:c1] = jnp.dot(
                probs, vh, preferred_element_type=jnp.float32)

    # ---- output projection + residual + LayerNorm 1 ----
    attn = jnp.dot(attn_scratch[...], wo_ref[...],
                   preferred_element_type=jnp.float32) + bo_ref[...]
    x1 = _layer_norm(x + attn, ln1g_ref[...], ln1b_ref[...])

    # ---- position-wise feed-forward (LeakyReLU 0.1) + residual + LayerNorm 2 ----
    h1 = jnp.dot(x1, w1_ref[...], preferred_element_type=jnp.float32) + b1_ref[...]
    h1 = jnp.where(h1 > 0, h1, 0.1 * h1)
    h2 = jnp.dot(h1, w2_ref[...], preferred_element_type=jnp.float32) + b2_ref[...]

    o_ref[...] = _layer_norm(x1 + h2, ln2g_ref[...], ln2b_ref[...])


def encoder_layer(x, mask, params):
    """x: (B, S, D) f32; mask: (B, 1, S) f32 (1 keep / 0 masked)."""
    wq, wk, wv, wo, bo, w1, b1, w2, b2, ln1g, ln1b, ln2g, ln2b = params

    # One-time layout plumbing outside the kernel:
    #  - torch nn.Linear stores weights as (out, in); kernel wants (in, out)
    #  - fuse Wq/Wk/Wv into a single (D, 3D) matrix
    wqkv = jnp.concatenate([wq.T, wk.T, wv.T], axis=1)   # (D, 3D) = (32, 96)
    wo_t = wo.T                                          # (D, D)
    w1_t = w1.T                                          # (D, D_FF)
    w2_t = w2.T                                          # (D_FF, D)

    x2d = x.reshape(ROWS, D_MODEL)                       # fold batch into rows
    mask2d = mask.reshape(B, S)

    n_inputs = 13
    in_specs = [pl.BlockSpec(memory_space=pltpu.MemorySpace.VMEM)
                for _ in range(n_inputs)]
    out_spec = pl.BlockSpec(memory_space=pltpu.MemorySpace.VMEM)

    out2d = pl.pallas_call(
        encoder_layer_kernel,
        out_shape=jax.ShapeDtypeStruct((ROWS, D_MODEL), jnp.float32),
        in_specs=in_specs,
        out_specs=out_spec,
        scratch_shapes=[pltpu.VMEM((ROWS, D_MODEL), jnp.float32)],
    )(x2d, mask2d, wqkv, wo_t, bo, w1_t, b1, w2_t, b2,
      ln1g, ln1b, ln2g, ln2b)

    return out2d.reshape(B, S, D_MODEL)


def reference(x, mask, params):
    """Pure-JAX reference mirroring the PyTorch forward (eval mode)."""
    wq, wk, wv, wo, bo, w1, b1, w2, b2, ln1g, ln1b, ln2g, ln2b = params
    q = x @ wq.T
    k = x @ wk.T
    v = x @ wv.T

    def split(t):  # (B,S,D) -> (B,H,S,d_k)
        return t.reshape(B, S, N_HEADS, D_K).transpose(0, 2, 1, 3)

    qh, kh, vh = split(q), split(k), split(v)
    score = jnp.einsum("bhqd,bhkd->bhqk", qh, kh) / math.sqrt(D_K)
    score = jnp.where(mask[:, :, None, :] > 0, score, -jnp.inf)
    probs = jax.nn.softmax(score, axis=-1)
    o = jnp.einsum("bhqk,bhkd->bhqd", probs, vh)
    o = o.transpose(0, 2, 1, 3).reshape(B, S, D_MODEL)
    o = o @ wo.T + bo

    def ln(t, g, bta):
        mu = jnp.mean(t, -1, keepdims=True)
        var = jnp.mean((t - mu) ** 2, -1, keepdims=True)
        return (t - mu) / jnp.sqrt(var + LN_EPS) * g + bta

    x1 = ln(x + o, ln1g, ln1b)
    h = x1 @ w1.T + b1
    h = jnp.where(h > 0, h, 0.1 * h)
    h = h @ w2.T + b2
    return ln(x1 + h, ln2g, ln2b)


def init_params(key):
    ks = jax.random.split(key, 8)
    wq = 0.05 * jax.random.normal(ks[0], (D_MODEL, D_MODEL), jnp.float32)
    wk = 0.05 * jax.random.normal(ks[1], (D_MODEL, D_MODEL), jnp.float32)
    wv = 0.05 * jax.random.normal(ks[2], (D_MODEL, D_MODEL), jnp.float32)
    wo = 0.05 * jax.random.normal(ks[3], (D_MODEL, D_MODEL), jnp.float32)
    bo = 0.01 * jax.random.normal(ks[4], (1, D_MODEL), jnp.float32)
    w1 = 0.05 * jax.random.normal(ks[5], (D_FF, D_MODEL), jnp.float32)
    b1 = 0.01 * jax.random.normal(ks[6], (1, D_FF), jnp.float32)
    w2 = 0.05 * jax.random.normal(ks[7], (D_MODEL, D_FF), jnp.float32)
    b2 = jnp.zeros((1, D_MODEL), jnp.float32)
    ln1g = jnp.ones((1, D_MODEL), jnp.float32)
    ln1b = jnp.zeros((1, D_MODEL), jnp.float32)
    ln2g = jnp.ones((1, D_MODEL), jnp.float32)
    ln2b = jnp.zeros((1, D_MODEL), jnp.float32)
    return (wq, wk, wv, wo, bo, w1, b1, w2, b2, ln1g, ln1b, ln2g, ln2b)


if __name__ == "__main__":
    key = jax.random.PRNGKey(0)
    k_x, k_p = jax.random.split(key)
    x = jax.random.normal(k_x, (B, S, D_MODEL), jnp.float32)
    # padding mask: batch 0 fully valid, batch 1 has last 2 positions masked
    mask = np.ones((B, 1, S), np.float32)
    mask[1, 0, -2:] = 0.0
    mask = jnp.asarray(mask)

    params = init_params(k_p)

    out = encoder_layer(x, mask, params)
    out = jax.block_until_ready(out)

    ref = reference(x, mask, params)
    np.testing.assert_allclose(np.asarray(out), np.asarray(ref), rtol=1e-3, atol=1e-3)

    print("KERNEL_OK")
</pallas_src>

<mosaic_0001>
module attributes {stable_mosaic.version = 11 : i64} {
  func.func @encoder_layer_kernel(%arg0: memref<16x32xf32, #tpu.memory_space<vmem>>, %arg1: memref<2x8xf32, #tpu.memory_space<vmem>>, %arg2: memref<32x96xf32, #tpu.memory_space<vmem>>, %arg3: memref<32x32xf32, #tpu.memory_space<vmem>>, %arg4: memref<1x32xf32, #tpu.memory_space<vmem>>, %arg5: memref<32x64xf32, #tpu.memory_space<vmem>>, %arg6: memref<1x64xf32, #tpu.memory_space<vmem>>, %arg7: memref<64x32xf32, #tpu.memory_space<vmem>>, %arg8: memref<1x32xf32, #tpu.memory_space<vmem>>, %arg9: memref<1x32xf32, #tpu.memory_space<vmem>>, %arg10: memref<1x32xf32, #tpu.memory_space<vmem>>, %arg11: memref<1x32xf32, #tpu.memory_space<vmem>>, %arg12: memref<1x32xf32, #tpu.memory_space<vmem>>, %arg13: memref<16x32xf32, #tpu.memory_space<vmem>>, %arg14: memref<16x32xf32, #tpu.memory_space<vmem>>) attributes {dimension_semantics = [], scalar_prefetch = 0 : i64, scratch_operands = 1 : i64, tpu.core_type = #tpu.core_type<tc>} {
    %c0 = arith.constant 0 : index
    %c0_0 = arith.constant 0 : index
    %0 = vector.load %arg0[%c0, %c0_0] : memref<16x32xf32, #tpu.memory_space<vmem>>, vector<16x32xf32>
    %c0_1 = arith.constant 0 : index
    %c0_2 = arith.constant 0 : index
    %1 = vector.load %arg1[%c0_1, %c0_2] : memref<2x8xf32, #tpu.memory_space<vmem>>, vector<2x8xf32>
    %c0_3 = arith.constant 0 : index
    %c0_4 = arith.constant 0 : index
    %2 = vector.load %arg2[%c0_3, %c0_4] : memref<32x96xf32, #tpu.memory_space<vmem>>, vector<32x96xf32>
    %cst = arith.constant dense<0.000000e+00> : vector<16x96xf32>
    %3 = tpu.matmul %0, %2, %cst {dimension_numbers = #tpu.dot_dimension_numbers<[1], [0], [0], [1], [0, 0, 1, 1], [], []>} : vector<16x32xf32>, vector<32x96xf32>, vector<16x96xf32> -> vector<16x96xf32>
    %4 = vector.extract_strided_slice %3 {offsets = [0, 0], sizes = [16, 32], strides = [1, 1]} : vector<16x96xf32> to vector<16x32xf32>
    %5 = vector.extract_strided_slice %3 {offsets = [0, 32], sizes = [16, 32], strides = [1, 1]} : vector<16x96xf32> to vector<16x32xf32>
    %6 = vector.extract_strided_slice %3 {offsets = [0, 64], sizes = [16, 32], strides = [1, 1]} : vector<16x96xf32> to vector<16x32xf32>
    %7 = vector.extract_strided_slice %1 {offsets = [0, 0], sizes = [1, 8], strides = [1, 1]} : vector<2x8xf32> to vector<1x8xf32>
    %8 = vector.extract_strided_slice %4 {offsets = [0, 0], sizes = [8, 8], strides = [1, 1]} : vector<16x32xf32> to vector<8x8xf32>
    %9 = vector.extract_strided_slice %5 {offsets = [0, 0], sizes = [8, 8], strides = [1, 1]} : vector<16x32xf32> to vector<8x8xf32>
    %10 = vector.extract_strided_slice %6 {offsets = [0, 0], sizes = [8, 8], strides = [1, 1]} : vector<16x32xf32> to vector<8x8xf32>
    %cst_5 = arith.constant dense<0.000000e+00> : vector<8x8xf32>
    %11 = tpu.matmul %8, %9, %cst_5 {dimension_numbers = #tpu.dot_dimension_numbers<[1], [1], [0], [0], [0, 0, 1, 0], [], []>} : vector<8x8xf32>, vector<8x8xf32>, vector<8x8xf32> -> vector<8x8xf32>
    %cst_6 = arith.constant 0.353553385 : f32
    %12 = vector.broadcast %cst_6 : f32 to vector<8x8xf32>
    %13 = arith.mulf %11, %12 : vector<8x8xf32>
    %cst_7 = arith.constant 0.000000e+00 : f32
    %14 = vector.broadcast %cst_7 : f32 to vector<1x8xf32>
    %15 = arith.cmpf ogt, %7, %14 : vector<1x8xf32>
    %cst_8 = arith.constant 0xFF800000 : f32
    %16 = vector.shape_cast %15 : vector<1x8xi1> to vector<1x8xi1>
    %17 = vector.broadcast %16 : vector<1x8xi1> to vector<8x8xi1>
    %18 = vector.broadcast %cst_8 : f32 to vector<8x8xf32>
    %19 = arith.select %17, %13, %18 : vector<8x8xi1>, vector<8x8xf32>
    %cst_9 = arith.constant dense<0xFF800000> : vector<8xf32>
    %20 = vector.multi_reduction <maximumf>, %19, %cst_9 [1] : vector<8x8xf32> to vector<8xf32>
    %21 = vector.shape_cast %20 : vector<8xf32> to vector<8x1xf32>
    %22 = vector.broadcast %21 : vector<8x1xf32> to vector<8x8xf32>
    %23 = arith.subf %19, %22 : vector<8x8xf32>
    %24 = math.exp %23 : vector<8x8xf32>
    %cst_10 = arith.constant dense<0.000000e+00> : vector<8xf32>
    %25 = vector.multi_reduction <add>, %24, %cst_10 [1] : vector<8x8xf32> to vector<8xf32>
    %26 = vector.shape_cast %25 : vector<8xf32> to vector<8x1xf32>
    %27 = tpu.reciprocal %26 {approx = true} : vector<8x1xf32> -> vector<8x1xf32>
    %28 = vector.broadcast %27 : vector<8x1xf32> to vector<8x8xf32>
    %29 = arith.mulf %24, %28 : vector<8x8xf32>
    %cst_11 = arith.constant dense<0.000000e+00> : vector<8x8xf32>
    %30 = tpu.matmul %29, %10, %cst_11 {dimension_numbers = #tpu.dot_dimension_numbers<[1], [0], [0], [1], [0, 0, 1, 1], [], []>} : vector<8x8xf32>, vector<8x8xf32>, vector<8x8xf32> -> vector<8x8xf32>
    %c0_12 = arith.constant 0 : index
    %c0_13 = arith.constant 0 : index
    %31 = vector.load %arg14[%c0_12, %c0_13] : memref<16x32xf32, #tpu.memory_space<vmem>>, vector<8x8xf32>
    tpu.vector_store %arg14[%c0_12, %c0_13], %30 {strides = array<i32>} : memref<16x32xf32, #tpu.memory_space<vmem>>, vector<8x8xf32>,
    %32 = vector.extract_strided_slice %4 {offsets = [0, 8], sizes = [8, 8], strides = [1, 1]} : vector<16x32xf32> to vector<8x8xf32>
    %33 = vector.extract_strided_slice %5 {offsets = [0, 8], sizes = [8, 8], strides = [1, 1]} : vector<16x32xf32> to vector<8x8xf32>
    %34 = vector.extract_strided_slice %6 {offsets = [0, 8], sizes = [8, 8], strides = [1, 1]} : vector<16x32xf32> to vector<8x8xf32>
    %cst_14 = arith.constant dense<0.000000e+00> : vector<8x8xf32>
    %35 = tpu.matmul %32, %33, %cst_14 {dimension_numbers = #tpu.dot_dimension_numbers<[1], [1], [0], [0], [0, 0, 1, 0], [], []>} : vector<8x8xf32>, vector<8x8xf32>, vector<8x8xf32> -> vector<8x8xf32>
    %cst_15 = arith.constant 0.353553385 : f32
    %36 = vector.broadcast %cst_15 : f32 to vector<8x8xf32>
    %37 = arith.mulf %35, %36 : vector<8x8xf32>
    %cst_16 = arith.constant 0.000000e+00 : f32
    %38 = vector.broadcast %cst_16 : f32 to vector<1x8xf32>
    %39 = arith.cmpf ogt, %7, %38 : vector<1x8xf32>
    %cst_17 = arith.constant 0xFF800000 : f32
    %40 = vector.shape_cast %39 : vector<1x8xi1> to vector<1x8xi1>
    %41 = vector.broadcast %40 : vector<1x8xi1> to vector<8x8xi1>
    %42 = vector.broadcast %cst_17 : f32 to vector<8x8xf32>
    %43 = arith.select %41, %37, %42 : vector<8x8xi1>, vector<8x8xf32>
    %cst_18 = arith.constant dense<0xFF800000> : vector<8xf32>
    %44 = vector.multi_reduction <maximumf>, %43, %cst_18 [1] : vector<8x8xf32> to vector<8xf32>
    %45 = vector.shape_cast %44 : vector<8xf32> to vector<8x1xf32>
    %46 = vector.broadcast %45 : vector<8x1xf32> to vector<8x8xf32>
    %47 = arith.subf %43, %46 : vector<8x8xf32>
    %48 = math.exp %47 : vector<8x8xf32>
    %cst_19 = arith.constant dense<0.000000e+00> : vector<8xf32>
    %49 = vector.multi_reduction <add>, %48, %cst_19 [1] : vector<8x8xf32> to vector<8xf32>
    %50 = vector.shape_cast %49 : vector<8xf32> to vector<8x1xf32>
    %51 = tpu.reciprocal %50 {approx = true} : vector<8x1xf32> -> vector<8x1xf32>
    %52 = vector.broadcast %51 : vector<8x1xf32> to vector<8x8xf32>
    %53 = arith.mulf %48, %52 : vector<8x8xf32>
    %cst_20 = arith.constant dense<0.000000e+00> : vector<8x8xf32>
    %54 = tpu.matmul %53, %34, %cst_20 {dimension_numbers = #tpu.dot_dimension_numbers<[1], [0], [0], [1], [0, 0, 1, 1], [], []>} : vector<8x8xf32>, vector<8x8xf32>, vector<8x8xf32> -> vector<8x8xf32>
    %c0_21 = arith.constant 0 : index
    %c8 = arith.constant 8 : index
    %55 = vector.load %arg14[%c0_21, %c8] : memref<16x32xf32, #tpu.memory_space<vmem>>, vector<8x8xf32>
    tpu.vector_store %arg14[%c0_21, %c8], %54 {strides = array<i32>} : memref<16x32xf32, #tpu.memory_space<vmem>>, vector<8x8xf32>,
    %56 = vector.extract_strided_slice %4 {offsets = [0, 16], sizes = [8, 8], strides = [1, 1]} : vector<16x32xf32> to vector<8x8xf32>
    %57 = vector.extract_strided_slice %5 {offsets = [0, 16], sizes = [8, 8], strides = [1, 1]} : vector<16x32xf32> to vector<8x8xf32>
    %58 = vector.extract_strided_slice %6 {offsets = [0, 16], sizes = [8, 8], strides = [1, 1]} : vector<16x32xf32> to vector<8x8xf32>
    %cst_22 = arith.constant dense<0.000000e+00> : vector<8x8xf32>
    %59 = tpu.matmul %56, %57, %cst_22 {dimension_numbers = #tpu.dot_dimension_numbers<[1], [1], [0], [0], [0, 0, 1, 0], [], []>} : vector<8x8xf32>, vector<8x8xf32>, vector<8x8xf32> -> vector<8x8xf32>
    %cst_23 = arith.constant 0.353553385 : f32
    %60 = vector.broadcast %cst_23 : f32 to vector<8x8xf32>
    %61 = arith.mulf %59, %60 : vector<8x8xf32>
    %cst_24 = arith.constant 0.000000e+00 : f32
    %62 = vector.broadcast %cst_24 : f32 to vector<1x8xf32>
    %63 = arith.cmpf ogt, %7, %62 : vector<1x8xf32>
    %cst_25 = arith.constant 0xFF800000 : f32
    %64 = vector.shape_cast %63 : vector<1x8xi1> to vector<1x8xi1>
    %65 = vector.broadcast %64 : vector<1x8xi1> to vector<8x8xi1>
    %66 = vector.broadcast %cst_25 : f32 to vector<8x8xf32>
    %67 = arith.select %65, %61, %66 : vector<8x8xi1>, vector<8x8xf32>
    %cst_26 = arith.constant dense<0xFF800000> : vector<8xf32>
    %68 = vector.multi_reduction <maximumf>, %67, %cst_26 [1] : vector<8x8xf32> to vector<8xf32>
    %69 = vector.shape_cast %68 : vector<8xf32> to vector<8x1xf32>
    %70 = vector.broadcast %69 : vector<8x1xf32> to vector<8x8xf32>
    %71 = arith.subf %67, %70 : vector<8x8xf32>
    %72 = math.exp %71 : vector<8x8xf32>
    %cst_27 = arith.constant dense<0.000000e+00> : vector<8xf32>
    %73 = vector.multi_reduction <add>, %72, %cst_27 [1] : vector<8x8xf32> to vector<8xf32>
    %74 = vector.shape_cast %73 : vector<8xf32> to vector<8x1xf32>
    %75 = tpu.reciprocal %74 {approx = true} : vector<8x1xf32> -> vector<8x1xf32>
    %76 = vector.broadcast %75 : vector<8x1xf32> to vector<8x8xf32>
    %77 = arith.mulf %72, %76 : vector<8x8xf32>
    %cst_28 = arith.constant dense<0.000000e+00> : vector<8x8xf32>
    %78 = tpu.matmul %77, %58, %cst_28 {dimension_numbers = #tpu.dot_dimension_numbers<[1], [0], [0], [1], [0, 0, 1, 1], [], []>} : vector<8x8xf32>, vector<8x8xf32>, vector<8x8xf32> -> vector<8x8xf32>
    %c0_29 = arith.constant 0 : index
    %c16 = arith.constant 16 : index
    %79 = vector.load %arg14[%c0_29, %c16] : memref<16x32xf32, #tpu.memory_space<vmem>>, vector<8x8xf32>
    tpu.vector_store %arg14[%c0_29, %c16], %78 {strides = array<i32>} : memref<16x32xf32, #tpu.memory_space<vmem>>, vector<8x8xf32>,
    %80 = vector.extract_strided_slice %4 {offsets = [0, 24], sizes = [8, 8], strides = [1, 1]} : vector<16x32xf32> to vector<8x8xf32>
    %81 = vector.extract_strided_slice %5 {offsets = [0, 24], sizes = [8, 8], strides = [1, 1]} : vector<16x32xf32> to vector<8x8xf32>
    %82 = vector.extract_strided_slice %6 {offsets = [0, 24], sizes = [8, 8], strides = [1, 1]} : vector<16x32xf32> to vector<8x8xf32>
    %cst_30 = arith.constant dense<0.000000e+00> : vector<8x8xf32>
    %83 = tpu.matmul %80, %81, %cst_30 {dimension_numbers = #tpu.dot_dimension_numbers<[1], [1], [0], [0], [0, 0, 1, 0], [], []>} : vector<8x8xf32>, vector<8x8xf32>, vector<8x8xf32> -> vector<8x8xf32>
    %cst_31 = arith.constant 0.353553385 : f32
    %84 = vector.broadcast %cst_31 : f32 to vector<8x8xf32>
    %85 = arith.mulf %83, %84 : vector<8x8xf32>
    %cst_32 = arith.constant 0.000000e+00 : f32
    %86 = vector.broadcast %cst_32 : f32 to vector<1x8xf32>
    %87 = arith.cmpf ogt, %7, %86 : vector<1x8xf32>
    %cst_33 = arith.constant 0xFF800000 : f32
    %88 = vector.shape_cast %87 : vector<1x8xi1> to vector<1x8xi1>
    %89 = vector.broadcast %88 : vector<1x8xi1> to vector<8x8xi1>
    %90 = vector.broadcast %cst_33 : f32 to vector<8x8xf32>
    %91 = arith.select %89, %85, %90 : vector<8x8xi1>, vector<8x8xf32>
    %cst_34 = arith.constant dense<0xFF800000> : vector<8xf32>
    %92 = vector.multi_reduction <maximumf>, %91, %cst_34 [1] : vector<8x8xf32> to vector<8xf32>
    %93 = vector.shape_cast %92 : vector<8xf32> to vector<8x1xf32>
    %94 = vector.broadcast %93 : vector<8x1xf32> to vector<8x8xf32>
    %95 = arith.subf %91, %94 : vector<8x8xf32>
    %96 = math.exp %95 : vector<8x8xf32>
    %cst_35 = arith.constant dense<0.000000e+00> : vector<8xf32>
    %97 = vector.multi_reduction <add>, %96, %cst_35 [1] : vector<8x8xf32> to vector<8xf32>
    %98 = vector.shape_cast %97 : vector<8xf32> to vector<8x1xf32>
    %99 = tpu.reciprocal %98 {approx = true} : vector<8x1xf32> -> vector<8x1xf32>
    %100 = vector.broadcast %99 : vector<8x1xf32> to vector<8x8xf32>
    %101 = arith.mulf %96, %100 : vector<8x8xf32>
    %cst_36 = arith.constant dense<0.000000e+00> : vector<8x8xf32>
    %102 = tpu.matmul %101, %82, %cst_36 {dimension_numbers = #tpu.dot_dimension_numbers<[1], [0], [0], [1], [0, 0, 1, 1], [], []>} : vector<8x8xf32>, vector<8x8xf32>, vector<8x8xf32> -> vector<8x8xf32>
    %c0_37 = arith.constant 0 : index
    %c24 = arith.constant 24 : index
    %103 = vector.load %arg14[%c0_37, %c24] : memref<16x32xf32, #tpu.memory_space<vmem>>, vector<8x8xf32>
    tpu.vector_store %arg14[%c0_37, %c24], %102 {strides = array<i32>} : memref<16x32xf32, #tpu.memory_space<vmem>>, vector<8x8xf32>,
    %104 = vector.extract_strided_slice %1 {offsets = [1, 0], sizes = [1, 8], strides = [1, 1]} : vector<2x8xf32> to vector<1x8xf32>
    %105 = vector.extract_strided_slice %4 {offsets = [8, 0], sizes = [8, 8], strides = [1, 1]} : vector<16x32xf32> to vector<8x8xf32>
    %106 = vector.extract_strided_slice %5 {offsets = [8, 0], sizes = [8, 8], strides = [1, 1]} : vector<16x32xf32> to vector<8x8xf32>
    %107 = vector.extract_strided_slice %6 {offsets = [8, 0], sizes = [8, 8], strides = [1, 1]} : vector<16x32xf32> to vector<8x8xf32>
    %cst_38 = arith.constant dense<0.000000e+00> : vector<8x8xf32>
    %108 = tpu.matmul %105, %106, %cst_38 {dimension_numbers = #tpu.dot_dimension_numbers<[1], [1], [0], [0], [0, 0, 1, 0], [], []>} : vector<8x8xf32>, vector<8x8xf32>, vector<8x8xf32> -> vector<8x8xf32>
    %cst_39 = arith.constant 0.353553385 : f32
    %109 = vector.broadcast %cst_39 : f32 to vector<8x8xf32>
    %110 = arith.mulf %108, %109 : vector<8x8xf32>
    %cst_40 = arith.constant 0.000000e+00 : f32
    %111 = vector.broadcast %cst_40 : f32 to vector<1x8xf32>
    %112 = arith.cmpf ogt, %104, %111 : vector<1x8xf32>
    %cst_41 = arith.constant 0xFF800000 : f32
    %113 = vector.shape_cast %112 : vector<1x8xi1> to vector<1x8xi1>
    %114 = vector.broadcast %113 : vector<1x8xi1> to vector<8x8xi1>
    %115 = vector.broadcast %cst_41 : f32 to vector<8x8xf32>
    %116 = arith.select %114, %110, %115 : vector<8x8xi1>, vector<8x8xf32>
    %cst_42 = arith.constant dense<0xFF800000> : vector<8xf32>
    %117 = vector.multi_reduction <maximumf>, %116, %cst_42 [1] : vector<8x8xf32> to vector<8xf32>
    %118 = vector.shape_cast %117 : vector<8xf32> to vector<8x1xf32>
    %119 = vector.broadcast %118 : vector<8x1xf32> to vector<8x8xf32>
    %120 = arith.subf %116, %119 : vector<8x8xf32>
    %121 = math.exp %120 : vector<8x8xf32>
    %cst_43 = arith.constant dense<0.000000e+00> : vector<8xf32>
    %122 = vector.multi_reduction <add>, %121, %cst_43 [1] : vector<8x8xf32> to vector<8xf32>
    %123 = vector.shape_cast %122 : vector<8xf32> to vector<8x1xf32>
    %124 = tpu.reciprocal %123 {approx = true} : vector<8x1xf32> -> vector<8x1xf32>
    %125 = vector.broadcast %124 : vector<8x1xf32> to vector<8x8xf32>
    %126 = arith.mulf %121, %125 : vector<8x8xf32>
    %cst_44 = arith.constant dense<0.000000e+00> : vector<8x8xf32>
    %127 = tpu.matmul %126, %107, %cst_44 {dimension_numbers = #tpu.dot_dimension_numbers<[1], [0], [0], [1], [0, 0, 1, 1], [], []>} : vector<8x8xf32>, vector<8x8xf32>, vector<8x8xf32> -> vector<8x8xf32>
    %c8_45 = arith.constant 8 : index
    %c0_46 = arith.constant 0 : index
    %128 = vector.load %arg14[%c8_45, %c0_46] : memref<16x32xf32, #tpu.memory_space<vmem>>, vector<8x8xf32>
    tpu.vector_store %arg14[%c8_45, %c0_46], %127 {strides = array<i32>} : memref<16x32xf32, #tpu.memory_space<vmem>>, vector<8x8xf32>,
    %129 = vector.extract_strided_slice %4 {offsets = [8, 8], sizes = [8, 8], strides = [1, 1]} : vector<16x32xf32> to vector<8x8xf32>
    %130 = vector.extract_strided_slice %5 {offsets = [8, 8], sizes = [8, 8], strides = [1, 1]} : vector<16x32xf32> to vector<8x8xf32>
    %131 = vector.extract_strided_slice %6 {offsets = [8, 8], sizes = [8, 8], strides = [1, 1]} : vector<16x32xf32> to vector<8x8xf32>
    %cst_47 = arith.constant dense<0.000000e+00> : vector<8x8xf32>
    %132 = tpu.matmul %129, %130, %cst_47 {dimension_numbers = #tpu.dot_dimension_numbers<[1], [1], [0], [0], [0, 0, 1, 0], [], []>} : vector<8x8xf32>, vector<8x8xf32>, vector<8x8xf32> -> vector<8x8xf32>
    %cst_48 = arith.constant 0.353553385 : f32
    %133 = vector.broadcast %cst_48 : f32 to vector<8x8xf32>
    %134 = arith.mulf %132, %133 : vector<8x8xf32>
    %cst_49 = arith.constant 0.000000e+00 : f32
    %135 = vector.broadcast %cst_49 : f32 to vector<1x8xf32>
    %136 = arith.cmpf ogt, %104, %135 : vector<1x8xf32>
    %cst_50 = arith.constant 0xFF800000 : f32
    %137 = vector.shape_cast %136 : vector<1x8xi1> to vector<1x8xi1>
    %138 = vector.broadcast %137 : vector<1x8xi1> to vector<8x8xi1>
    %139 = vector.broadcast %cst_50 : f32 to vector<8x8xf32>
    %140 = arith.select %138, %134, %139 : vector<8x8xi1>, vector<8x8xf32>
    %cst_51 = arith.constant dense<0xFF800000> : vector<8xf32>
    %141 = vector.multi_reduction <maximumf>, %140, %cst_51 [1] : vector<8x8xf32> to vector<8xf32>
    %142 = vector.shape_cast %141 : vector<8xf32> to vector<8x1xf32>
    %143 = vector.broadcast %142 : vector<8x1xf32> to vector<8x8xf32>
    %144 = arith.subf %140, %143 : vector<8x8xf32>
    %145 = math.exp %144 : vector<8x8xf32>
    %cst_52 = arith.constant dense<0.000000e+00> : vector<8xf32>
    %146 = vector.multi_reduction <add>, %145, %cst_52 [1] : vector<8x8xf32> to vector<8xf32>
    %147 = vector.shape_cast %146 : vector<8xf32> to vector<8x1xf32>
    %148 = tpu.reciprocal %147 {approx = true} : vector<8x1xf32> -> vector<8x1xf32>
    %149 = vector.broadcast %148 : vector<8x1xf32> to vector<8x8xf32>
    %150 = arith.mulf %145, %149 : vector<8x8xf32>
    %cst_53 = arith.constant dense<0.000000e+00> : vector<8x8xf32>
    %151 = tpu.matmul %150, %131, %cst_53 {dimension_numbers = #tpu.dot_dimension_numbers<[1], [0], [0], [1], [0, 0, 1, 1], [], []>} : vector<8x8xf32>, vector<8x8xf32>, vector<8x8xf32> -> vector<8x8xf32>
    %c8_54 = arith.constant 8 : index
    %c8_55 = arith.constant 8 : index
    %152 = vector.load %arg14[%c8_54, %c8_55] : memref<16x32xf32, #tpu.memory_space<vmem>>, vector<8x8xf32>
    tpu.vector_store %arg14[%c8_54, %c8_55], %151 {strides = array<i32>} : memref<16x32xf32, #tpu.memory_space<vmem>>, vector<8x8xf32>,
    %153 = vector.extract_strided_slice %4 {offsets = [8, 16], sizes = [8, 8], strides = [1, 1]} : vector<16x32xf32> to vector<8x8xf32>
    %154 = vector.extract_strided_slice %5 {offsets = [8, 16], sizes = [8, 8], strides = [1, 1]} : vector<16x32xf32> to vector<8x8xf32>
    %155 = vector.extract_strided_slice %6 {offsets = [8, 16], sizes = [8, 8], strides = [1, 1]} : vector<16x32xf32> to vector<8x8xf32>
    %cst_56 = arith.constant dense<0.000000e+00> : vector<8x8xf32>
    %156 = tpu.matmul %153, %154, %cst_56 {dimension_numbers = #tpu.dot_dimension_numbers<[1], [1], [0], [0], [0, 0, 1, 0], [], []>} : vector<8x8xf32>, vector<8x8xf32>, vector<8x8xf32> -> vector<8x8xf32>
    %cst_57 = arith.constant 0.353553385 : f32
    %157 = vector.broadcast %cst_57 : f32 to vector<8x8xf32>
    %158 = arith.mulf %156, %157 : vector<8x8xf32>
    %cst_58 = arith.constant 0.000000e+00 : f32
    %159 = vector.broadcast %cst_58 : f32 to vector<1x8xf32>
    %160 = arith.cmpf ogt, %104, %159 : vector<1x8xf32>
    %cst_59 = arith.constant 0xFF800000 : f32
    %161 = vector.shape_cast %160 : vector<1x8xi1> to vector<1x8xi1>
    %162 = vector.broadcast %161 : vector<1x8xi1> to vector<8x8xi1>
    %163 = vector.broadcast %cst_59 : f32 to vector<8x8xf32>
    %164 = arith.select %162, %158, %163 : vector<8x8xi1>, vector<8x8xf32>
    %cst_60 = arith.constant dense<0xFF800000> : vector<8xf32>
    %165 = vector.multi_reduction <maximumf>, %164, %cst_60 [1] : vector<8x8xf32> to vector<8xf32>
    %166 = vector.shape_cast %165 : vector<8xf32> to vector<8x1xf32>
    %167 = vector.broadcast %166 : vector<8x1xf32> to vector<8x8xf32>
    %168 = arith.subf %164, %167 : vector<8x8xf32>
    %169 = math.exp %168 : vector<8x8xf32>
    %cst_61 = arith.constant dense<0.000000e+00> : vector<8xf32>
    %170 = vector.multi_reduction <add>, %169, %cst_61 [1] : vector<8x8xf32> to vector<8xf32>
    %171 = vector.shape_cast %170 : vector<8xf32> to vector<8x1xf32>
    %172 = tpu.reciprocal %171 {approx = true} : vector<8x1xf32> -> vector<8x1xf32>
    %173 = vector.broadcast %172 : vector<8x1xf32> to vector<8x8xf32>
    %174 = arith.mulf %169, %173 : vector<8x8xf32>
    %cst_62 = arith.constant dense<0.000000e+00> : vector<8x8xf32>
    %175 = tpu.matmul %174, %155, %cst_62 {dimension_numbers = #tpu.dot_dimension_numbers<[1], [0], [0], [1], [0, 0, 1, 1], [], []>} : vector<8x8xf32>, vector<8x8xf32>, vector<8x8xf32> -> vector<8x8xf32>
    %c8_63 = arith.constant 8 : index
    %c16_64 = arith.constant 16 : index
    %176 = vector.load %arg14[%c8_63, %c16_64] : memref<16x32xf32, #tpu.memory_space<vmem>>, vector<8x8xf32>
    tpu.vector_store %arg14[%c8_63, %c16_64], %175 {strides = array<i32>} : memref<16x32xf32, #tpu.memory_space<vmem>>, vector<8x8xf32>,
    %177 = vector.extract_strided_slice %4 {offsets = [8, 24], sizes = [8, 8], strides = [1, 1]} : vector<16x32xf32> to vector<8x8xf32>
    %178 = vector.extract_strided_slice %5 {offsets = [8, 24], sizes = [8, 8], strides = [1, 1]} : vector<16x32xf32> to vector<8x8xf32>
    %179 = vector.extract_strided_slice %6 {offsets = [8, 24], sizes = [8, 8], strides = [1, 1]} : vector<16x32xf32> to vector<8x8xf32>
    %cst_65 = arith.constant dense<0.000000e+00> : vector<8x8xf32>
    %180 = tpu.matmul %177, %178, %cst_65 {dimension_numbers = #tpu.dot_dimension_numbers<[1], [1], [0], [0], [0, 0, 1, 0], [], []>} : vector<8x8xf32>, vector<8x8xf32>, vector<8x8xf32> -> vector<8x8xf32>
    %cst_66 = arith.constant 0.353553385 : f32
    %181 = vector.broadcast %cst_66 : f32 to vector<8x8xf32>
    %182 = arith.mulf %180, %181 : vector<8x8xf32>
    %cst_67 = arith.constant 0.000000e+00 : f32
    %183 = vector.broadcast %cst_67 : f32 to vector<1x8xf32>
    %184 = arith.cmpf ogt, %104, %183 : vector<1x8xf32>
    %cst_68 = arith.constant 0xFF800000 : f32
    %185 = vector.shape_cast %184 : vector<1x8xi1> to vector<1x8xi1>
    %186 = vector.broadcast %185 : vector<1x8xi1> to vector<8x8xi1>
    %187 = vector.broadcast %cst_68 : f32 to vector<8x8xf32>
    %188 = arith.select %186, %182, %187 : vector<8x8xi1>, vector<8x8xf32>
    %cst_69 = arith.constant dense<0xFF800000> : vector<8xf32>
    %189 = vector.multi_reduction <maximumf>, %188, %cst_69 [1] : vector<8x8xf32> to vector<8xf32>
    %190 = vector.shape_cast %189 : vector<8xf32> to vector<8x1xf32>
    %191 = vector.broadcast %190 : vector<8x1xf32> to vector<8x8xf32>
    %192 = arith.subf %188, %191 : vector<8x8xf32>
    %193 = math.exp %192 : vector<8x8xf32>
    %cst_70 = arith.constant dense<0.000000e+00> : vector<8xf32>
    %194 = vector.multi_reduction <add>, %193, %cst_70 [1] : vector<8x8xf32> to vector<8xf32>
    %195 = vector.shape_cast %194 : vector<8xf32> to vector<8x1xf32>
    %196 = tpu.reciprocal %195 {approx = true} : vector<8x1xf32> -> vector<8x1xf32>
    %197 = vector.broadcast %196 : vector<8x1xf32> to vector<8x8xf32>
    %198 = arith.mulf %193, %197 : vector<8x8xf32>
    %cst_71 = arith.constant dense<0.000000e+00> : vector<8x8xf32>
    %199 = tpu.matmul %198, %179, %cst_71 {dimension_numbers = #tpu.dot_dimension_numbers<[1], [0], [0], [1], [0, 0, 1, 1], [], []>} : vector<8x8xf32>, vector<8x8xf32>, vector<8x8xf32> -> vector<8x8xf32>
    %c8_72 = arith.constant 8 : index
    %c24_73 = arith.constant 24 : index
    %200 = vector.load %arg14[%c8_72, %c24_73] : memref<16x32xf32, #tpu.memory_space<vmem>>, vector<8x8xf32>
    tpu.vector_store %arg14[%c8_72, %c24_73], %199 {strides = array<i32>} : memref<16x32xf32, #tpu.memory_space<vmem>>, vector<8x8xf32>,
    %c0_74 = arith.constant 0 : index
    %c0_75 = arith.constant 0 : index
    %201 = vector.load %arg14[%c0_74, %c0_75] : memref<16x32xf32, #tpu.memory_space<vmem>>, vector<16x32xf32>
    %c0_76 = arith.constant 0 : index
    %c0_77 = arith.constant 0 : index
    %202 = vector.load %arg3[%c0_76, %c0_77] : memref<32x32xf32, #tpu.memory_space<vmem>>, vector<32x32xf32>
    %cst_78 = arith.constant dense<0.000000e+00> : vector<16x32xf32>
    %203 = tpu.matmul %201, %202, %cst_78 {dimension_numbers = #tpu.dot_dimension_numbers<[1], [0], [0], [1], [0, 0, 1, 1], [], []>} : vector<16x32xf32>, vector<32x32xf32>, vector<16x32xf32> -> vector<16x32xf32>
    %c0_79 = arith.constant 0 : index
    %c0_80 = arith.constant 0 : index
    %204 = vector.load %arg4[%c0_79, %c0_80] : memref<1x32xf32, #tpu.memory_space<vmem>>, vector<1x32xf32>
    %205 = vector.broadcast %204 : vector<1x32xf32> to vector<16x32xf32>
    %206 = arith.addf %203, %205 : vector<16x32xf32>
    %207 = arith.addf %0, %206 : vector<16x32xf32>
    %c0_81 = arith.constant 0 : index
    %c0_82 = arith.constant 0 : index
    %208 = vector.load %arg9[%c0_81, %c0_82] : memref<1x32xf32, #tpu.memory_space<vmem>>, vector<1x32xf32>
    %c0_83 = arith.constant 0 : index
    %c0_84 = arith.constant 0 : index
    %209 = vector.load %arg10[%c0_83, %c0_84] : memref<1x32xf32, #tpu.memory_space<vmem>>, vector<1x32xf32>
    %cst_85 = arith.constant dense<0.000000e+00> : vector<16xf32>
    %210 = vector.multi_reduction <add>, %207, %cst_85 [1] : vector<16x32xf32> to vector<16xf32>
    %211 = vector.shape_cast %210 : vector<16xf32> to vector<16x1xf32>
    %cst_86 = arith.constant 3.200000e+01 : f32
    %212 = vector.broadcast %cst_86 : f32 to vector<16x1xf32>
    %213 = arith.divf %211, %212 : vector<16x1xf32>
    %214 = vector.broadcast %213 : vector<16x1xf32> to vector<16x32xf32>
    %215 = arith.subf %207, %214 : vector<16x32xf32>
    %216 = arith.mulf %215, %215 : vector<16x32xf32>
    %cst_87 = arith.constant dense<0.000000e+00> : vector<16xf32>
    %217 = vector.multi_reduction <add>, %216, %cst_87 [1] : vector<16x32xf32> to vector<16xf32>
    %218 = vector.shape_cast %217 : vector<16xf32> to vector<16x1xf32>
    %cst_88 = arith.constant 3.200000e+01 : f32
    %219 = vector.broadcast %cst_88 : f32 to vector<16x1xf32>
    %220 = arith.divf %218, %219 : vector<16x1xf32>
    %221 = vector.broadcast %213 : vector<16x1xf32> to vector<16x32xf32>
    %222 = arith.subf %207, %221 : vector<16x32xf32>
    %cst_89 = arith.constant 9.99999997E-7 : f32
    %223 = vector.broadcast %cst_89 : f32 to vector<16x1xf32>
    %224 = arith.addf %220, %223 : vector<16x1xf32>
    %225 = math.rsqrt %224 : vector<16x1xf32>
    %226 = vector.broadcast %225 : vector<16x1xf32> to vector<16x32xf32>
    %227 = arith.mulf %222, %226 : vector<16x32xf32>
    %228 = vector.broadcast %208 : vector<1x32xf32> to vector<16x32xf32>
    %229 = arith.mulf %227, %228 : vector<16x32xf32>
    %230 = vector.broadcast %209 : vector<1x32xf32> to vector<16x32xf32>
    %231 = arith.addf %229, %230 : vector<16x32xf32>
    %c0_90 = arith.constant 0 : index
    %c0_91 = arith.constant 0 : index
    %232 = vector.load %arg5[%c0_90, %c0_91] : memref<32x64xf32, #tpu.memory_space<vmem>>, vector<32x64xf32>
    %cst_92 = arith.constant dense<0.000000e+00> : vector<16x64xf32>
    %233 = tpu.matmul %231, %232, %cst_92 {dimension_numbers = #tpu.dot_dimension_numbers<[1], [0], [0], [1], [0, 0, 1, 1], [], []>} : vector<16x32xf32>, vector<32x64xf32>, vector<16x64xf32> -> vector<16x64xf32>
    %c0_93 = arith.constant 0 : index
    %c0_94 = arith.constant 0 : index
    %234 = vector.load %arg6[%c0_93, %c0_94] : memref<1x64xf32, #tpu.memory_space<vmem>>, vector<1x64xf32>
    %235 = vector.broadcast %234 : vector<1x64xf32> to vector<16x64xf32>
    %236 = arith.addf %233, %235 : vector<16x64xf32>
    %cst_95 = arith.constant 0.000000e+00 : f32
    %237 = vector.broadcast %cst_95 : f32 to vector<16x64xf32>
    %238 = arith.cmpf ogt, %236, %237 : vector<16x64xf32>
    %cst_96 = arith.constant 1.000000e-01 : f32
    %239 = vector.broadcast %cst_96 : f32 to vector<16x64xf32>
    %240 = arith.mulf %239, %236 : vector<16x64xf32>
    %241 = arith.select %238, %236, %240 : vector<16x64xi1>, vector<16x64xf32>
    %c0_97 = arith.constant 0 : index
    %c0_98 = arith.constant 0 : index
    %242 = vector.load %arg7[%c0_97, %c0_98] : memref<64x32xf32, #tpu.memory_space<vmem>>, vector<64x32xf32>
    %cst_99 = arith.constant dense<0.000000e+00> : vector<16x32xf32>
    %243 = tpu.matmul %241, %242, %cst_99 {dimension_numbers = #tpu.dot_dimension_numbers<[1], [0], [0], [1], [0, 0, 1, 1], [], []>} : vector<16x64xf32>, vector<64x32xf32>, vector<16x32xf32> -> vector<16x32xf32>
    %c0_100 = arith.constant 0 : index
    %c0_101 = arith.constant 0 : index
    %244 = vector.load %arg8[%c0_100, %c0_101] : memref<1x32xf32, #tpu.memory_space<vmem>>, vector<1x32xf32>
    %245 = vector.broadcast %244 : vector<1x32xf32> to vector<16x32xf32>
    %246 = arith.addf %243, %245 : vector<16x32xf32>
    %247 = arith.addf %231, %246 : vector<16x32xf32>
    %c0_102 = arith.constant 0 : index
    %c0_103 = arith.constant 0 : index
    %248 = vector.load %arg11[%c0_102, %c0_103] : memref<1x32xf32, #tpu.memory_space<vmem>>, vector<1x32xf32>
    %c0_104 = arith.constant 0 : index
    %c0_105 = arith.constant 0 : index
    %249 = vector.load %arg12[%c0_104, %c0_105] : memref<1x32xf32, #tpu.memory_space<vmem>>, vector<1x32xf32>
    %cst_106 = arith.constant dense<0.000000e+00> : vector<16xf32>
    %250 = vector.multi_reduction <add>, %247, %cst_106 [1] : vector<16x32xf32> to vector<16xf32>
    %251 = vector.shape_cast %250 : vector<16xf32> to vector<16x1xf32>
    %cst_107 = arith.constant 3.200000e+01 : f32
    %252 = vector.broadcast %cst_107 : f32 to vector<16x1xf32>
    %253 = arith.divf %251, %252 : vector<16x1xf32>
    %254 = vector.broadcast %253 : vector<16x1xf32> to vector<16x32xf32>
    %255 = arith.subf %247, %254 : vector<16x32xf32>
    %256 = arith.mulf %255, %255 : vector<16x32xf32>
    %cst_108 = arith.constant dense<0.000000e+00> : vector<16xf32>
    %257 = vector.multi_reduction <add>, %256, %cst_108 [1] : vector<16x32xf32> to vector<16xf32>
    %258 = vector.shape_cast %257 : vector<16xf32> to vector<16x1xf32>
    %cst_109 = arith.constant 3.200000e+01 : f32
    %259 = vector.broadcast %cst_109 : f32 to vector<16x1xf32>
    %260 = arith.divf %258, %259 : vector<16x1xf32>
    %261 = vector.broadcast %253 : vector<16x1xf32> to vector<16x32xf32>
    %262 = arith.subf %247, %261 : vector<16x32xf32>
    %cst_110 = arith.constant 9.99999997E-7 : f32
    %263 = vector.broadcast %cst_110 : f32 to vector<16x1xf32>
    %264 = arith.addf %260, %263 : vector<16x1xf32>
    %265 = math.rsqrt %264 : vector<16x1xf32>
    %266 = vector.broadcast %265 : vector<16x1xf32> to vector<16x32xf32>
    %267 = arith.mulf %262, %266 : vector<16x32xf32>
    %268 = vector.broadcast %248 : vector<1x32xf32> to vector<16x32xf32>
    %269 = arith.mulf %267, %268 : vector<16x32xf32>
    %270 = vector.broadcast %249 : vector<1x32xf32> to vector<16x32xf32>
    %271 = arith.addf %269, %270 : vector<16x32xf32>
    %c0_111 = arith.constant 0 : index
    %c0_112 = arith.constant 0 : index
    %272 = vector.load %arg13[%c0_111, %c0_112] : memref<16x32xf32, #tpu.memory_space<vmem>>, vector<16x32xf32>
    tpu.vector_store %arg13[%c0_111, %c0_112], %271 {strides = array<i32>} : memref<16x32xf32, #tpu.memory_space<vmem>>, vector<16x32xf32>,
    return
  }
}

</mosaic_0001>

<bundles_post_ra>
// kernel: tpu_custom_call.1
= control target key start
LH: loop header
LB: loop body
LE: loop exit
PB: predicated region body
PF: predicated region fallthrough
CT: control target
= control target key end

     0   :  { %18 = vsyncpa [#allocation4], 0  ;;  %s2668_s0 = inlined_call_operand.hbm [shape: f32[16,32], index: 0, kind: input, shape index: {}]   ;;  %s2669_s1 = inlined_call_operand.hbm [shape: f32[2,8], index: 1, kind: input, shape index: {}]   ;;  %s2670_s2 = inlined_call_operand.vmem [shape: f32[32,96], index: 2, kind: input, shape index: {}]   ;;  %s2671_s3 = inlined_call_operand.vmem [shape: f32[32,32], index: 3, kind: input, shape index: {}]   ;;  %s2672_s4 = inlined_call_operand.vmem [shape: f32[1,32], index: 4, kind: input, shape index: {}]   ;;  %s2673_s5 = inlined_call_operand.vmem [shape: f32[32,64], index: 5, kind: input, shape index: {}]   ;;  %s2674_s6 = inlined_call_operand.vmem [shape: f32[1,64], index: 6, kind: input, shape index: {}]   ;;  %s2675_s7 = inlined_call_operand.vmem [shape: f32[64,32], index: 7, kind: input, shape index: {}]   ;;  %s2676_s8 = inlined_call_operand.vmem [shape: f32[1,32], index: 8, kind: input, shape index: {}]   ;;  %s2677_s9 = inlined_call_operand.vmem [shape: f32[1,32], index: 9, kind: input, shape index: {}]   ;;  %s2678_s10 = inlined_call_operand.vmem [shape: f32[1,32], index: 10, kind: input, shape index: {}]   ;;  %s2679_s11 = inlined_call_operand.vmem [shape: f32[1,32], index: 11, kind: input, shape index: {}]   ;;  %s2680_s12 = inlined_call_operand.vmem [shape: f32[1,32], index: 12, kind: input, shape index: {}]   ;;  %s2681_s13 = inlined_call_operand.hbm [shape: f32[16,32], index: 13, kind: output, shape index: {}]  }
   0x1   :  { %19 = vsyncpa [#allocation7], 0 }
   0x2   :  { %20 = vsyncpa [#allocation5], 0  ;;  %s2302_s25 = smov [#allocation3]  }
   0x3   :  { %s26_s26 = sshll.u32 %s2302_s25, 4  ;;  %s27_s26 = int_to_ptr.vmem [resolvable:$true] %s26_s26 }
   0x4   :  { %s2244_s27 = scalar_lea.vmem %s27_s26, 256  ;;  %p2249_p1 = scmp.lt.s32.totalorder %s27_s26, %s27_s26 }
   0x5   :  { %p2245_p0 = scmp.ne.s32.totalorder %s27_s26, %s2244_s27  ;;  %p2250_p2 = scmp.lt.s32.totalorder %s2244_s27, %s2244_s27 }
   0x7   :  { %p2251_p3 = por %p2250_p2, %p2249_p1 }
   0x9   :  { %p2252_p4 = pnand %p2251_p3, %p2245_p0 }
   0xb   :  { %2255 = shalt.err (!%p2252_p4)
}
   0xc   :  { %s2303_s28 = smov 128   ;;  %s2304_s29 = smov 8  }
   0xd   :  { %32 = dma.hbm_to_vmem [thread:$0]  %s2668_s0, 256, %s27_s26, [#allocation4], %s2303_s28, %s2303_s28, %s2304_s29  }
   0xe   :  { %s2305_s15 = smov [#allocation6]  }
   0xf   :  { %s39_s16 = sshll.u32 %s2305_s15, 4  ;;  %s40_s16 = int_to_ptr.vmem [resolvable:$true] %s39_s16 }
  0x10   :  { %s2264_s17 = scalar_lea.vmem %s40_s16, 32  ;;  %p2269_p6 = scmp.lt.s32.totalorder %s40_s16, %s40_s16 }
  0x11   :  { %p2265_p5 = scmp.ne.s32.totalorder %s40_s16, %s2264_s17  ;;  %p2270_p7 = scmp.lt.s32.totalorder %s2264_s17, %s2264_s17 }
  0x13   :  { %p2271_p8 = por %p2270_p7, %p2269_p6 }
  0x15   :  { %p2272_p9 = pnand %p2271_p8, %p2265_p5 }
  0x17   :  { %2275 = shalt.err (!%p2272_p9)
}
  0x18   :  { %42 = dma.hbm_to_vmem [thread:$0]  %s2669_s1, 32, %s40_s16, [#allocation7]  }
  0x19   :  { %2296 = dma.done.wait [#allocation4], 256  }
  0x1a   :  { %2297 = vsyncadd [#allocation4], 4294967040 }
  0x1b   :  { %2298 = dma.done.wait [#allocation7], 32  }
  0x1c   :  { %2299 = vsyncadd [#allocation7], 4294967264  ;;  %vm78_vm0 = vcmask 261120   ;;  %v77_v0 = vld [vmem:[%s2670_s2 + $0x18] sm:$0xff]  ;;  %v76_v1 = vld [vmem:[%s2670_s2 + $0x10] sm:$0xff]  ;;  %v2306_v6 = vmov 0.0   ;;  %v241_v24 = vlaneseq }
  0x1d   :  { %2043 = vmatprep.subr.mxu1 %v77_v0  ;;  %v2408_v2 = vld [vmem:[#allocation3] sm:$0xff]  ;;  %v75_v3 = vld [vmem:[%s2670_s2 + $0x8] sm:$0xff]  ;;  %v74_v4 = vld [vmem:[%s2670_s2] sm:$0xff]  ;;  %2064 = vmatprep.subr.mxu0 %v2306_v6  ;;  %vm2307_vm1 = vmmov 0   ;;  %s2308_s2 = smov 120   ;;  %s2309_s26 = smov 96  }
  0x1e   :  { %2044 = vmatpush3.msra.mxu1 %v77_v0  ;;  %2051 = vmatprep.mubr.msk.f32.mxu1 %vm78_vm0, %v2408_v2  ;;  %v2418_v5 = vld [vmem:[#allocation3 + $0x8] sm:$0xff]  ;;  %s2310_s27 = smov 80   ;;  %s2311_s30 = smov 88   ;;  %vm163_vm2 = vcmask 64512   ;;  %v73_v25 = vld [vmem:[#allocation6] sm:$0x3] }
  0x1f   :  { %2045 = vmatprep.subr.mxu1 %v76_v1  ;;  %2066 = vmatprep.mubr.msk.f32.mxu0 %vm2307_vm1, %v2306_v6  ;;  %s2312_s14 = smov 72   ;;  %s2313_s15 = smov 112   ;;  %v242_v26 = vshrl.u32 %v241_v24, 7  ;;  %vm239_vm3 = vcmp.gt.f32.partialorder %v73_v25, 0.0  ;;  %v2317_v28 = vmov 0   ;;  %vm506_vm6 = vcmask 130112  }
  0x20   :  { %2046 = vmatpush3.msra.mxu1 %v76_v1  ;;  %s2314_s16 = smov 104   ;;  %s2315_s17 = smov 56   ;;  %v240_v29 = vsel %vm239_vm3, 1, %v2317_v28  ;;  %vm679_vm7 = vcmask 195712   ;;  %vm852_vm8 = vcmask 261312   ;;  %vm1796_vm11 = vcmask 523264  }
  0x21   :  { %2047 = vmatprep.subr.mxu1 %v75_v3  ;;  %s2316_s18 = smov 64   ;;  %v243_v27 = vsub.s32 0, %v242_v26  ;;  %v934_v42 = vsub.s32 1, %v242_v26  ;;  %s2318_s19 = smov 40  }
  0x22   :  { %2048 = vmatpush3.msra.mxu1 %v75_v3  ;;  %s2319_s0 = smov 48   ;;  %s2320_s20 = smov 16  }
  0x23   :  { %2049 = vmatprep.subr.mxu1 %v74_v4  ;;  %v244_v30 = vrot.slane %v240_v29, %v243_v27  ;;  %v935_v48 = vrot.slane %v240_v29, %v934_v42  ;;  %s2321_s21 = smov 24   ;;  %s2322_s22 = smov [#allocation8]  }
  0x24   :  { %2050 = vmatpush3.msra.mxu1 %v74_v4  ;;  %s1931_s23 = sshll.u32 %s2322_s22, 4  ;;  %s1932_s23 = int_to_ptr.vmem [resolvable:$true] %s1931_s23 }
  0x25   :  { %2052 = vmatmul.mubr.msk.f32.vlgmr.msra.gmra.mxu1 %vm78_vm0, %v2418_v5  ;;  %2054 = vmatprep.subr.mxu1 %v2306_v6  ;;  %vm245_vm4 = vcmp.eq.s32.totalorder %v244_v30, 1  ;;  %vm936_vm5 = vcmp.eq.s32.totalorder %v935_v48, 1  ;;  %s2276_s24 = scalar_lea.vmem %s1932_s23, 256  ;;  %p2281_p11 = scmp.lt.s32.totalorder %s1932_s23, %s1932_s23 }
  0x26   :  { %2056 = vmatprep.mubr.msk.f32.mxu1 %vm2307_vm1, %v2306_v6  ;;  %p2277_p10 = scmp.ne.s32.totalorder %s1932_s23, %s2276_s24  ;;  %p2282_p12 = scmp.lt.s32.totalorder %s2276_s24, %s2276_s24 }
  0x28   :  { %p2283_p13 = por %p2282_p12, %p2281_p11 }
  0x2a   :  { %p2284_p0 = pnand %p2283_p13, %p2277_p10 }
  0xe5   :  { %v2428_v7 = vpop.f32.mrf.mxu1 }
  0xe7   :  { %v2430_v8 = vpop.f32.mrf.mxu1 }
  0xe8   :  { %335 = vrot.lane.b32.xlu1 %v2430_v8, %s2308_s2  ;;  %161 = vrot.lane.b32.xlu0 %v2430_v8, %s2309_s26 }
  0xec   :  { %510 = vrot.lane.b32.xlu1 %v2430_v8, %s2310_s27  ;;  %337 = vrot.lane.b32.xlu0 %v2430_v8, %s2311_s30 }
  0xf0   :  { %683 = vrot.lane.b32.xlu1 %v2430_v8, %s2312_s14  ;;  %508 = vrot.lane.b32.xlu0 %v2430_v8, %s2313_s15 }
  0xf4   :  { %855 = vrot.lane.b32.xlu1 %v2428_v7, %s2309_s26  ;;  %681 = vrot.lane.b32.xlu0 %v2430_v8, %s2314_s16 }
  0xf8   :  { %1026 = vrot.lane.b32.xlu1 %v2428_v7, %s2308_s2  ;;  %1028 = vrot.lane.b32.xlu0 %v2428_v7, %s2311_s30 }
  0xfc   :  { %1198 = vrot.lane.b32.xlu1 %v2428_v7, %s2313_s15  ;;  %1200 = vrot.lane.b32.xlu0 %v2428_v7, %s2310_s27 }
 0x100   :  { %1370 = vrot.lane.b32.xlu1 %v2428_v7, %s2314_s16  ;;  %1372 = vrot.lane.b32.xlu0 %v2428_v7, %s2312_s14 }
 0x104   :  { %426 = vrot.lane.b32.xlu1 %v2430_v8, %s2315_s17  ;;  %258 = vrot.lane.b32.xlu0 %v2430_v8, %s2316_s18 }
 0x15a   :  { %v336_v9 = vpop.permute.xlu1 %335  ;;  %v162_v10 = vpop.permute.xlu0 %161 }
 0x15b   :  { %2055 = vmatpush3.xpose.msk.msra.mxu1 %vm163_vm2, %v162_v10 }
 0x15c   :  { %2059 = vmatprep.subr.mxu1 %v2306_v6 }
 0x15e   :  { %v511_v11 = vpop.permute.xlu1 %510  ;;  %2057 = vmatmul.mubr.msk.f32.vlgmr.msra.gmra.mxu1 %vm163_vm2, %v2430_v8  ;;  %v338_v12 = vpop.permute.xlu0 %337 }
 0x15f   :  { %2065 = vmatpush3.xpose.msk.msra.mxu0 %vm163_vm2, %v338_v12  ;;  %2061 = vmatprep.mubr.msk.f32.mxu1 %vm2307_vm1, %v2306_v6 }
 0x160   :  { %2074 = vmatprep.subr.mxu0 %v2306_v6 }
 0x162   :  { %v684_v13 = vpop.permute.xlu1 %683  ;;  %2067 = vmatmul.mubr.msk.f32.vlgmr.msra.gmra.mxu0 %vm163_vm2, %v336_v9  ;;  %v509_v14 = vpop.permute.xlu0 %508 }
 0x163   :  { %2075 = vmatpush3.xpose.msk.msra.mxu0 %vm163_vm2, %v511_v11  ;;  %2076 = vmatprep.mubr.msk.f32.mxu0 %vm2307_vm1, %v2306_v6 }
 0x164   :  { %2084 = vmatprep.subr.mxu0 %v2306_v6 }
 0x166   :  { %2077 = vmatmul.mubr.msk.f32.vlgmr.msra.gmra.mxu0 %vm163_vm2, %v509_v14  ;;  %v682_v15 = vpop.permute.xlu0 %681  ;;  %v856_v16 = vpop.permute.xlu1 %855 }
 0x167   :  { %2085 = vmatpush3.xpose.msk.msra.mxu0 %vm163_vm2, %v684_v13  ;;  %2086 = vmatprep.mubr.msk.f32.mxu0 %vm2307_vm1, %v2306_v6 }
 0x168   :  { %2094 = vmatprep.subr.mxu0 %v2306_v6 }
 0x16a   :  { %2087 = vmatmul.mubr.msk.f32.vlgmr.msra.gmra.mxu0 %vm163_vm2, %v682_v15  ;;  %v1029_v17 = vpop.permute.xlu0 %1028  ;;  %v1027_v18 = vpop.permute.xlu1 %1026 }
 0x16b   :  { %2095 = vmatpush3.xpose.msk.msra.mxu0 %vm163_vm2, %v856_v16  ;;  %2096 = vmatprep.mubr.msk.f32.mxu0 %vm2307_vm1, %v2306_v6 }
 0x16c   :  { %2104 = vmatprep.subr.mxu0 %v2306_v6 }
 0x16e   :  { %2097 = vmatmul.mubr.msk.f32.vlgmr.msra.gmra.mxu0 %vm163_vm2, %v2428_v7  ;;  %v1201_v19 = vpop.permute.xlu0 %1200  ;;  %v1199_v21 = vpop.permute.xlu1 %1198 }
 0x16f   :  { %2105 = vmatpush3.xpose.msk.msra.mxu0 %vm163_vm2, %v1029_v17  ;;  %2106 = vmatprep.mubr.msk.f32.mxu0 %vm2307_vm1, %v2306_v6 }
 0x170   :  { %2114 = vmatprep.subr.mxu0 %v2306_v6 }
 0x172   :  { %2107 = vmatmul.mubr.msk.f32.vlgmr.msra.gmra.mxu0 %vm163_vm2, %v1027_v18  ;;  %v1373_v20 = vpop.permute.xlu0 %1372  ;;  %v1371_v23 = vpop.permute.xlu1 %1370 }
 0x173   :  { %2115 = vmatpush3.xpose.msk.msra.mxu0 %vm163_vm2, %v1201_v19  ;;  %2116 = vmatprep.mubr.msk.f32.mxu0 %vm2307_vm1, %v2306_v6 }
 0x174   :  { %2124 = vmatprep.subr.mxu0 %v2306_v6 }
 0x176   :  { %2117 = vmatmul.mubr.msk.f32.vlgmr.msra.gmra.mxu0 %vm163_vm2, %v1199_v21  ;;  %v259_v22 = vpop.permute.xlu0 %258  ;;  %v2510_v14 = vpop.permute.xlu1 %426 }
 0x177   :  { %2060 = vmatpush3.msra.mxu1 %v259_v22  ;;  %2125 = vmatpush3.xpose.msk.msra.mxu0 %vm163_vm2, %v1373_v20 }
 0x178   :  { %2126 = vmatprep.mubr.msk.f32.mxu0 %vm2307_vm1, %v2306_v6  ;;  %2069 = vmatprep.subr.mxu1 %v2306_v6 }
 0x17a   :  { %2127 = vmatmul.mubr.msk.f32.vlgmr.msra.gmra.mxu0 %vm163_vm2, %v1371_v23 }
 0x21e   :  { %v234_v31 = vpop.f32.mrf.mxu1 }
 0x21f   :  { %v238_v32 = vmul.f32 0.35355338, %v234_v31 }
 0x220   :  { %v2058_v33 = vpop.f32.mrf.mxu1 }
 0x221   :  { %v246_v34 = vsel %vm245_vm4, %v238_v32, -inf }
 0x222   :  { %v409_v35 = vpop.f32.mrf.mxu0  ;;  %v247_v36 = vsel %vm163_vm2, %v246_v34, -inf }
 0x223   :  { %v413_v37 = vmul.f32 0.35355338, %v409_v35  ;;  %248 = vmax.xlane.f32.xlu0 %v247_v36 }
 0x224   :  { %v2068_v38 = vpop.f32.mrf.mxu0 }
 0x225   :  { %v414_v39 = vsel %vm245_vm4, %v413_v37, -inf }
 0x226   :  { %v582_v40 = vpop.f32.mrf.mxu0  ;;  %v415_v41 = vsel %vm163_vm2, %v414_v39, -inf }
 0x227   :  { %v586_v43 = vmul.f32 0.35355338, %v582_v40  ;;  %416 = vmax.xlane.f32.xlu1 %v415_v41 }
 0x228   :  { %v2078_v44 = vpop.f32.mrf.mxu0 }
 0x229   :  { %v587_v45 = vsel %vm245_vm4, %v586_v43, -inf }
 0x22a   :  { %v755_v46 = vpop.f32.mrf.mxu0  ;;  %v588_v47 = vsel %vm163_vm2, %v587_v45, -inf }
 0x22b   :  { %v759_v49 = vmul.f32 0.35355338, %v755_v46  ;;  %589 = vmax.xlane.f32.xlu0 %v588_v47 }
 0x22c   :  { %v2088_v50 = vpop.f32.mrf.mxu0 }
 0x22d   :  { %v760_v51 = vsel %vm245_vm4, %v759_v49, -inf }
 0x22e   :  { %v927_v52 = vpop.f32.mrf.mxu0  ;;  %v761_v53 = vsel %vm163_vm2, %v760_v51, -inf }
 0x22f   :  { %v931_v54 = vmul.f32 0.35355338, %v927_v52  ;;  %762 = vmax.xlane.f32.xlu0 %v761_v53 }
 0x230   :  { %v2098_v55 = vpop.f32.mrf.mxu0 }
 0x231   :  { %v937_v56 = vsel %vm936_vm5, %v931_v54, -inf }
 0x232   :  { %v1100_v57 = vpop.f32.mrf.mxu0  ;;  %v938_v58 = vsel %vm163_vm2, %v937_v56, -inf }
 0x233   :  { %v1104_v59 = vmul.f32 0.35355338, %v1100_v57  ;;  %939 = vmax.xlane.f32.xlu1 %v938_v58 }
 0x234   :  { %v2108_v60 = vpop.f32.mrf.mxu0 }
 0x235   :  { %v1105_v61 = vsel %vm936_vm5, %v1104_v59, -inf }
 0x236   :  { %v1272_v62 = vpop.f32.mrf.mxu0  ;;  %v1106_v63 = vsel %vm163_vm2, %v1105_v61, -inf }
 0x237   :  { %v1276_v0 = vmul.f32 0.35355338, %v1272_v62  ;;  %1107 = vmax.xlane.f32.xlu0 %v1106_v63 }
 0x238   :  { %v2118_v1 = vpop.f32.mrf.mxu0 }
 0x239   :  { %v1277_v3 = vsel %vm936_vm5, %v1276_v0, -inf }
 0x23a   :  { %v1444_v4 = vpop.f32.mrf.mxu0  ;;  %v1278_v9 = vsel %vm163_vm2, %v1277_v3, -inf }
 0x23b   :  { %v1448_v10 = vmul.f32 0.35355338, %v1444_v4  ;;  %1279 = vmax.xlane.f32.xlu1 %v1278_v9 }
 0x23c   :  { %v2128_v11 = vpop.f32.mrf.mxu0 }
 0x23d   :  { %v1449_v12 = vsel %vm936_vm5, %v1448_v10, -inf }
 0x23e   :  { %v1450_v13 = vsel %vm163_vm2, %v1449_v12, -inf }
 0x23f   :  { %1451 = vmax.xlane.f32.xlu0 %v1450_v13 }
 0x24c   :  { %772 = vrot.lane.b32.xlu1 %v2430_v8, %s2318_s19 }
 0x255   :  { %599 = vrot.lane.b32.xlu0 %v2430_v8, %s2319_s0 }
 0x2ac   :  { %v249_v15 = vpop.xlane.xlu0 %248 }
 0x2ad   :  { %v250_v16 = vsub.f32 %v246_v34, %v249_v15 }
 0x2af   :  { %v251_v17 = vmul.f32 1.442695, %v250_v16 }
 0x2b0   :  { %v417_v18 = vpop.xlane.xlu1 %416 }
 0x2b1   :  { %2196 = vpow2.f32 %v251_v17  ;;  %v418_v19 = vsub.f32 %v414_v39, %v417_v18 }
 0x2b3   :  { %v419_v20 = vmul.f32 1.442695, %v418_v19 }
 0x2b4   :  { %v590_v21 = vpop.xlane.xlu0 %589 }
 0x2b5   :  { %2198 = vpow2.f32 %v419_v20  ;;  %v591_v22 = vsub.f32 %v587_v45, %v590_v21 }
 0x2b7   :  { %v592_v23 = vmul.f32 1.442695, %v591_v22 }
 0x2b8   :  { %v763_v24 = vpop.xlane.xlu0 %762 }
 0x2b9   :  { %2200 = vpow2.f32 %v592_v23  ;;  %v764_v25 = vsub.f32 %v760_v51, %v763_v24 }
 0x2bb   :  { %v765_v26 = vmul.f32 1.442695, %v764_v25 }
 0x2bc   :  { %v940_v34 = vpop.xlane.xlu1 %939 }
 0x2bd   :  { %2202 = vpow2.f32 %v765_v26  ;;  %v941_v35 = vsub.f32 %v937_v56, %v940_v34  ;;  %v1545_v34 = vld [vmem:[%s2671_s3 + $0x8] sm:$0xff] }
 0x2be   :  { %v2197_v27 = vpop.eup %2196 }
 0x2bf   :  { %v253_v8 = vsel %vm163_vm2, %v2197_v27, 0.0  ;;  %v942_v39 = vmul.f32 1.442695, %v941_v35 }
 0x2c0   :  { %254 = vadd.xlane.f32.xlu1 %v253_v8  ;;  %v1108_v36 = vpop.xlane.xlu0 %1107 }
 0x2c1   :  { %v1109_v38 = vsub.f32 %v1105_v61, %v1108_v36  ;;  %2204 = vpow2.f32 %v942_v39  ;;  %v1544_v36 = vld [vmem:[%s2671_s3] sm:$0xff] }
 0x2c2   :  { %v2199_v28 = vpop.eup %2198 }
 0x2c3   :  { %v421_v29 = vsel %vm163_vm2, %v2199_v28, 0.0  ;;  %v1110_v42 = vmul.f32 1.442695, %v1109_v38 }
 0x2c4   :  { %422 = vadd.xlane.f32.xlu0 %v421_v29  ;;  %v1280_v37 = vpop.xlane.xlu1 %1279 }
 0x2c5   :  { %v1281_v40 = vsub.f32 %v1277_v3, %v1280_v37  ;;  %2206 = vpow2.f32 %v1110_v42 }
 0x2c6   :  { %v2201_v30 = vpop.eup %2200 }
 0x2c7   :  { %v594_v31 = vsel %vm163_vm2, %v2201_v30, 0.0  ;;  %v1282_v43 = vmul.f32 1.442695, %v1281_v40 }
 0x2c8   :  { %595 = vadd.xlane.f32.xlu1 %v594_v31  ;;  %v1452_v41 = vpop.xlane.xlu0 %1451  ;;  %v773_v54 = vpop.permute.xlu1 %772  ;;  %v1547_v31 = vld [vmem:[%s2671_s3 + $0x18] sm:$0xff] }
 0x2c9   :  { %v1453_v44 = vsub.f32 %v1449_v12, %v1452_v41  ;;  %2208 = vpow2.f32 %v1282_v43  ;;  %2134 = vmatprep.subr.mxu0 %v1547_v31 }
 0x2ca   :  { %v2515_v32 = vpop.eup %2202  ;;  %2135 = vmatpush3.msra.mxu0 %v1547_v31  ;;  %v1782_v31 = vld [vmem:[%s2675_s7 + $0x8] sm:$0xff] }
 0x2cb   :  { %v767_v33 = vsel %vm163_vm2, %v2515_v32, 0.0  ;;  %v1454_v45 = vmul.f32 1.442695, %v1453_v44 }
 0x2cc   :  { %768 = vadd.xlane.f32.xlu0 %v767_v33  ;;  %v600_v55 = vpop.permute.xlu0 %599 }
 0x2cd   :  { %2210 = vpow2.f32 %v1454_v45 }
 0x2ce   :  { %v2205_v46 = vpop.eup %2204 }
 0x2cf   :  { %v944_v48 = vsel %vm163_vm2, %v2205_v46, 0.0 }
 0x2d2   :  { %v2523_v47 = vpop.eup %2206 }
 0x2d3   :  { %v1112_v51 = vsel %vm163_vm2, %v2523_v47, 0.0 }
 0x2d6   :  { %v2526_v49 = vpop.eup %2208 }
 0x2d7   :  { %v1284_v50 = vsel %vm163_vm2, %v2526_v49, 0.0 }
 0x2d9   :  { %1117 = vrot.lane.b32.xlu1 %v2428_v7, %s2315_s17 }
 0x2da   :  { %v2532_v52 = vpop.eup %2210 }
 0x2db   :  { %v1456_v53 = vsel %vm163_vm2, %v2532_v52, 0.0 }
 0x2e2   :  { %949 = vrot.lane.b32.xlu0 %v2428_v7, %s2316_s18 }
 0x2fd   :  { %945 = vadd.xlane.f32.xlu1 %v944_v48 }
 0x301   :  { %1285 = vadd.xlane.f32.xlu1 %v1284_v50  ;;  %1113 = vadd.xlane.f32.xlu0 %v1112_v51  ;;  %v1970_v50 = vld [vmem:[%s2672_s4] ss:$0 sm:$0xff] }
 0x305   :  { %1457 = vadd.xlane.f32.xlu1 %v1456_v53 }
 0x316   :  { %1461 = vrot.lane.b32.xlu1 %v2428_v7, %s2318_s19 }
 0x317   :  { %1289 = vrot.lane.b32.xlu0 %v2428_v7, %s2319_s0 }
 0x349   :  { %v255_v56 = vpop.xlane.xlu1 %254 }
 0x34a   :  { %2212 = vrcp.f32 %v255_v56 }
 0x34d   :  { %v423_v57 = vpop.xlane.xlu0 %422 }
 0x34e   :  { %2214 = vrcp.f32 %v423_v57 }
 0x351   :  { %v596_v58 = vpop.xlane.xlu1 %595 }
 0x352   :  { %2216 = vrcp.f32 %v596_v58 }
 0x355   :  { %v769_v59 = vpop.xlane.xlu0 %768  ;;  %v1118_v9 = vpop.permute.xlu1 %1117 }
 0x356   :  { %2218 = vrcp.f32 %v769_v59 }
 0x357   :  { %v2213_v60 = vpop.eup %2212 }
 0x358   :  { %v257_v61 = vmul.f32 %v2213_v60, %v2197_v27 }
 0x359   :  { %v950_v4 = vpop.permute.xlu0 %949 }
 0x35a   :  { %2062 = vmatmul.mubr.msk.f32.vlgmr.msra.gmra.mxu1 %vm163_vm2, %v257_v61 }
 0x35b   :  { %v2215_v62 = vpop.eup %2214  ;;  %2070 = vmatpush3.msra.mxu1 %v2510_v14  ;;  %2071 = vmatprep.mubr.msk.f32.mxu1 %vm2307_vm1, %v2306_v6 }
 0x35c   :  { %2079 = vmatprep.subr.mxu1 %v2306_v6  ;;  %v425_v7 = vmul.f32 %v2215_v62, %v2199_v28 }
 0x35e   :  { %2072 = vmatmul.mubr.msk.f32.vlgmr.msra.gmra.mxu1 %vm163_vm2, %v425_v7 }
 0x35f   :  { %v2217_v63 = vpop.eup %2216  ;;  %2080 = vmatpush3.msra.mxu1 %v600_v55  ;;  %2081 = vmatprep.mubr.msk.f32.mxu1 %vm2307_vm1, %v2306_v6 }
 0x360   :  { %2089 = vmatprep.subr.mxu1 %v2306_v6  ;;  %v598_v0 = vmul.f32 %v2217_v63, %v2201_v30 }
 0x362   :  { %2082 = vmatmul.mubr.msk.f32.vlgmr.msra.gmra.mxu1 %vm163_vm2, %v598_v0 }
 0x363   :  { %v2219_v1 = vpop.eup %2218  ;;  %2090 = vmatpush3.msra.mxu1 %v773_v54  ;;  %2091 = vmatprep.mubr.msk.f32.mxu1 %vm2307_vm1, %v2306_v6 }
 0x364   :  { %2099 = vmatprep.subr.mxu1 %v2306_v6  ;;  %v771_v3 = vmul.f32 %v2219_v1, %v2515_v32  ;;  %v1546_v32 = vld [vmem:[%s2671_s3 + $0x10] sm:$0xff] }
 0x365   :  { %2136 = vmatprep.subr.mxu0 %v1546_v32 }
 0x366   :  { %2092 = vmatmul.mubr.msk.f32.vlgmr.msra.gmra.mxu1 %vm163_vm2, %v771_v3  ;;  %2137 = vmatpush3.msra.mxu0 %v1546_v32  ;;  %v1781_v32 = vld [vmem:[%s2675_s7] sm:$0xff] }
 0x367   :  { %2100 = vmatpush3.msra.mxu1 %v950_v4  ;;  %2101 = vmatprep.mubr.msk.f32.mxu1 %vm2307_vm1, %v2306_v6  ;;  %v1685_v4 = vld [vmem:[%s2673_s5 + $0x10] sm:$0xff] }
 0x368   :  { %2109 = vmatprep.subr.mxu1 %v2306_v6  ;;  %2138 = vmatprep.subr.mxu0 %v1545_v34 }
 0x369   :  { %2139 = vmatpush3.msra.mxu0 %v1545_v34 }
 0x36a   :  { %2140 = vmatprep.subr.mxu0 %v1544_v36 }
 0x36b   :  { %2141 = vmatpush3.msra.mxu0 %v1544_v36 }
 0x386   :  { %v946_v10 = vpop.xlane.xlu1 %945 }
 0x387   :  { %2220 = vrcp.f32 %v946_v10  ;;  %v1683_v10 = vld [vmem:[%s2673_s5] sm:$0xff] }
 0x38a   :  { %v1286_v11 = vpop.xlane.xlu1 %1285  ;;  %v1114_v12 = vpop.xlane.xlu0 %1113 }
 0x38b   :  { %2222 = vrcp.f32 %v1114_v12  ;;  %v1787_v12 = vld [vmem:[%s2675_s7 + $0x30] sm:$0xff] }
 0x38c   :  { %2224 = vrcp.f32 %v1286_v11  ;;  %v1788_v11 = vld [vmem:[%s2675_s7 + $0x38] sm:$0xff] }
 0x38d   :  { %2156 = vmatprep.subr.mxu0 %v1788_v11 }
 0x38e   :  { %v1458_v13 = vpop.xlane.xlu1 %1457  ;;  %v1290_v19 = vpop.permute.xlu0 %1289 }
 0x38f   :  { %2226 = vrcp.f32 %v1458_v13  ;;  %v1786_v13 = vld [vmem:[%s2675_s7 + $0x28] sm:$0xff] }
 0x392   :  { %v1462_v22 = vpop.permute.xlu1 %1461 }
 0x394   :  { %v2221_v14 = vpop.eup %2220 }
 0x395   :  { %v948_v15 = vmul.f32 %v2221_v14, %v2205_v46  ;;  %v1785_v14 = vld [vmem:[%s2675_s7 + $0x20] sm:$0xff] }
 0x397   :  { %2102 = vmatmul.mubr.msk.f32.vlgmr.msra.gmra.mxu1 %vm163_vm2, %v948_v15 }
 0x398   :  { %2110 = vmatpush3.msra.mxu1 %v1118_v9  ;;  %2111 = vmatprep.mubr.msk.f32.mxu1 %vm2307_vm1, %v2306_v6  ;;  %v2223_v16 = vpop.eup %2222  ;;  %v1684_v9 = vld [vmem:[%s2673_s5 + $0x8] sm:$0xff] }
 0x399   :  { %2119 = vmatprep.subr.mxu1 %v2306_v6  ;;  %v1116_v17 = vmul.f32 %v2223_v16, %v2523_v47  ;;  %v2225_v18 = vpop.eup %2224 }
 0x39a   :  { %v1288_v20 = vmul.f32 %v2225_v18, %v2526_v49 }
 0x39b   :  { %2112 = vmatmul.mubr.msk.f32.vlgmr.msra.gmra.mxu1 %vm163_vm2, %v1116_v17 }
 0x39c   :  { %2120 = vmatpush3.msra.mxu1 %v1290_v19  ;;  %2121 = vmatprep.mubr.msk.f32.mxu1 %vm2307_vm1, %v2306_v6  ;;  %v2227_v21 = vpop.eup %2226 }
 0x39d   :  { %2129 = vmatprep.subr.mxu1 %v2306_v6  ;;  %v1460_v23 = vmul.f32 %v2227_v21, %v2532_v52 }
 0x39f   :  { %2122 = vmatmul.mubr.msk.f32.vlgmr.msra.gmra.mxu1 %vm163_vm2, %v1288_v20 }
 0x3a0   :  { %2130 = vmatpush3.msra.mxu1 %v1462_v22  ;;  %2131 = vmatprep.mubr.msk.f32.mxu1 %vm2307_vm1, %v2306_v6  ;;  %v1973_v22 = vld [vmem:[%s2677_s9] ss:$0 sm:$0xff] }
 0x3a3   :  { %2132 = vmatmul.mubr.msk.f32.vlgmr.msra.gmra.mxu1 %vm163_vm2, %v1460_v23 }
 0x41a   :  { %v330_v24 = vpop.f32.mrf.mxu1 }
 0x41b   :  { %334 = vst.msk [vmem:[#allocation2] sm:$0xff] %vm163_vm2, %v330_v24  ;;  %v1974_v24 = vld [vmem:[%s2678_s10] ss:$0 sm:$0xff] }
 0x41c   :  { %v2063_v25 = vpop.f32.mrf.mxu1 }
 0x41e   :  { %v498_v26 = vpop.f32.mrf.mxu1 }
 0x41f   :  { %503 = vrot.lane.b32.xlu0 %v498_v26, %s2304_s29 }
 0x420   :  { %v2073_v27 = vpop.f32.mrf.mxu1 }
 0x422   :  { %v671_v8 = vpop.f32.mrf.mxu1 }
 0x423   :  { %676 = vrot.lane.b32.xlu1 %v671_v8, %s2320_s20 }
 0x424   :  { %v2083_v28 = vpop.f32.mrf.mxu1 }
 0x426   :  { %v844_v29 = vpop.f32.mrf.mxu1 }
 0x427   :  { %849 = vrot.lane.b32.xlu1 %v844_v29, %s2321_s21 }
 0x428   :  { %v2093_v6 = vpop.f32.mrf.mxu1 }
 0x429   :  { %v1784_v6 = vld [vmem:[%s2675_s7 + $0x18] sm:$0xff] }
 0x457   :  { %v1021_v30 = vpop.f32.mrf.mxu1 }
 0x458   :  { %1025 = vst.msk [vmem:[#allocation2 + $0x8] sm:$0xff] %vm163_vm2, %v1021_v30  ;;  %v1783_v30 = vld [vmem:[%s2675_s7 + $0x10] sm:$0xff] }
 0x459   :  { %v2103_v33 = vpop.f32.mrf.mxu1 }
 0x45a   :  { %v1975_v33 = vld [vmem:[%s2674_s6] ss:$0 sm:$0xff] }
 0x45b   :  { %v1189_v35 = vpop.f32.mrf.mxu1 }
 0x45c   :  { %1194 = vrot.lane.b32.xlu0 %v1189_v35, %s2304_s29 }
 0x45d   :  { %v2113_v37 = vpop.f32.mrf.mxu1 }
 0x45f   :  { %v1361_v38 = vpop.f32.mrf.mxu1 }
 0x460   :  { %1366 = vrot.lane.b32.xlu0 %v1361_v38, %s2320_s20 }
 0x461   :  { %v2123_v39 = vpop.f32.mrf.mxu1 }
 0x463   :  { %v1533_v40 = vpop.f32.mrf.mxu1 }
 0x464   :  { %1538 = vrot.lane.b32.xlu1 %v1533_v40, %s2321_s21 }
 0x465   :  { %v2133_v41 = vpop.f32.mrf.mxu1 }
 0x491   :  { %v504_v42 = vpop.permute.xlu0 %503 }
 0x492   :  { %507 = vst.msk [vmem:[#allocation2] sm:$0xff] %vm506_vm6, %v504_v42  ;;  %v1978_v42 = vld [vmem:[%s2676_s8] ss:$0 sm:$0xff] }
 0x495   :  { %v677_v43 = vpop.permute.xlu1 %676 }
 0x496   :  { %680 = vst.msk [vmem:[#allocation2] sm:$0xff] %vm679_vm7, %v677_v43 }
 0x499   :  { %v850_v44 = vpop.permute.xlu1 %849 }
 0x49a   :  { %853 = vst.msk [vmem:[#allocation2] sm:$0xff] %vm852_vm8, %v850_v44 }
 0x4a1   :  { %v1542_v45 = vld [vmem:[#allocation2] sm:$0xff] }
 0x4a2   :  { %2142 = vmatprep.mubr.msk.f32.mxu0 %vm78_vm0, %v1542_v45 }
 0x4ce   :  { %v1195_v46 = vpop.permute.xlu0 %1194 }
 0x4cf   :  { %1197 = vst.msk [vmem:[#allocation2 + $0x8] sm:$0xff] %vm506_vm6, %v1195_v46 }
 0x4d2   :  { %v1367_v47 = vpop.permute.xlu0 %1366 }
 0x4d3   :  { %1369 = vst.msk [vmem:[#allocation2 + $0x8] sm:$0xff] %vm679_vm7, %v1367_v47 }
 0x4d6   :  { %v1539_v48 = vpop.permute.xlu1 %1538 }
 0x4d7   :  { %1541 = vst.msk [vmem:[#allocation2 + $0x8] sm:$0xff] %vm852_vm8, %v1539_v48 }
 0x4de   :  { %v1543_v49 = vld [vmem:[#allocation2 + $0x8] sm:$0xff] }
 0x4df   :  { %2143 = vmatmul.mubr.msk.f32.vlgmr.msra.gmra.mxu0 %vm78_vm0, %v1543_v49 }
 0x4e0   :  { %2157 = vmatpush3.msra.mxu0 %v1788_v11 }
 0x4e1   :  { %2158 = vmatprep.subr.mxu0 %v1787_v12 }
 0x4e2   :  { %2159 = vmatpush3.msra.mxu0 %v1787_v12 }
 0x4e3   :  { %2160 = vmatprep.subr.mxu0 %v1786_v13 }
 0x4e4   :  { %2161 = vmatpush3.msra.mxu0 %v1786_v13 }
 0x4e5   :  { %2162 = vmatprep.subr.mxu0 %v1785_v14 }
 0x4e6   :  { %2163 = vmatpush3.msra.mxu0 %v1785_v14 }
 0x4e7   :  { %2164 = vmatprep.subr.mxu0 %v1784_v6 }
 0x4e8   :  { %2165 = vmatpush3.msra.mxu0 %v1784_v6 }
 0x4e9   :  { %2166 = vmatprep.subr.mxu0 %v1783_v30 }
 0x4ea   :  { %2167 = vmatpush3.msra.mxu0 %v1783_v30 }
 0x4eb   :  { %2168 = vmatprep.subr.mxu0 %v1782_v31 }
 0x4ec   :  { %2169 = vmatpush3.msra.mxu0 %v1782_v31 }
 0x4ed   :  { %2170 = vmatprep.subr.mxu0 %v1781_v32 }
 0x4ee   :  { %2171 = vmatpush3.msra.mxu0 %v1781_v32 }
 0x59f   :  { %v2144_v51 = vpop.f32.mrf.mxu0 }
 0x5a0   :  { %v1633_v52 = vadd.f32 %v2144_v51, %v1970_v50 }
 0x5a1   :  { %v1627_v53 = vpop.f32.mrf.mxu0 }
 0x5a2   :  { %v1628_v54 = vadd.f32 %v1970_v50, %v1627_v53  ;;  %v1637_v55 = vadd.f32 %v1633_v52, %v2418_v5 }
 0x5a4   :  { %v1643_v56 = vsel %vm78_vm0, %v1637_v55, 0.0  ;;  %v1636_v57 = vadd.f32 %v1628_v54, %v2408_v2  ;;  %v1686_v2 = vld [vmem:[%s2673_s5 + $0x18] sm:$0xff] }
 0x5a5   :  { %1644 = vadd.xlane.f32.xlu1 %v1643_v56  ;;  %2145 = vmatprep.subr.mxu1 %v1686_v2 }
 0x5a6   :  { %v1640_v58 = vsel %vm78_vm0, %v1636_v57, 0.0  ;;  %2146 = vmatpush3.msra.mxu1 %v1686_v2 }
 0x5a7   :  { %1641 = vadd.xlane.f32.xlu0 %v1640_v58  ;;  %2147 = vmatprep.subr.mxu1 %v1685_v4 }
 0x5a8   :  { %2148 = vmatpush3.msra.mxu1 %v1685_v4 }
 0x5a9   :  { %2149 = vmatprep.subr.mxu1 %v1684_v9 }
 0x5aa   :  { %2150 = vmatpush3.msra.mxu1 %v1684_v9  ;;  %v1982_v9 = vld [vmem:[%s2680_s12] ss:$0 sm:$0xff] }
 0x5ab   :  { %2151 = vmatprep.subr.mxu1 %v1683_v10 }
 0x5ac   :  { %2152 = vmatpush3.msra.mxu1 %v1683_v10 }
 0x62e   :  { %v1645_v59 = vpop.xlane.xlu1 %1644 }
 0x62f   :  { %v1648_v60 = vmul.f32 0.03125, %v1645_v59 }
 0x630   :  { %v1642_v61 = vpop.xlane.xlu0 %1641 }
 0x631   :  { %v1647_v62 = vmul.f32 0.03125, %v1642_v61  ;;  %v1650_v7 = vsub.f32 %v1637_v55, %v1648_v60 }
 0x633   :  { %v1649_v63 = vsub.f32 %v1636_v57, %v1647_v62  ;;  %v1652_v3 = vmul.f32 %v1650_v7, %v1650_v7 }
 0x635   :  { %v1651_v0 = vmul.f32 %v1649_v63, %v1649_v63  ;;  %v1656_v5 = vsel %vm78_vm0, %v1652_v3, 0.0 }
 0x637   :  { %v1653_v1 = vsel %vm78_vm0, %v1651_v0, 0.0 }
 0x638   :  { %1654 = vadd.xlane.f32.xlu0 %v1653_v1 }
 0x63c   :  { %1657 = vadd.xlane.f32.xlu0 %v1656_v5  ;;  %v1981_v5 = vld [vmem:[%s2679_s11] ss:$0 sm:$0xff] }
 0x6c1   :  { %v1655_v15 = vpop.xlane.xlu0 %1654 }
 0x6c2   :  { %v1659_v16 = vmul.f32 0.03125, %v1655_v15 }
 0x6c4   :  { %v1661_v17 = vadd.f32 1e-06, %v1659_v16 }
 0x6c5   :  { %v1658_v18 = vpop.xlane.xlu0 %1657 }
 0x6c6   :  { %2228 = vrsqrt.f32 %v1661_v17  ;;  %v1660_v19 = vmul.f32 0.03125, %v1658_v18 }
 0x6c8   :  { %v1662_v20 = vadd.f32 1e-06, %v1660_v19 }
 0x6ca   :  { %2230 = vrsqrt.f32 %v1662_v20 }
 0x6d3   :  { %v2229_v21 = vpop.eup %2228 }
 0x6d4   :  { %v1665_v23 = vmul.f32 %v2229_v21, %v1649_v63 }
 0x6d6   :  { %v1673_v25 = vmul.f32 %v1973_v22, %v1665_v23 }
 0x6d7   :  { %v2231_v26 = vpop.eup %2230 }
 0x6d8   :  { %v1666_v27 = vmul.f32 %v2231_v26, %v1650_v7  ;;  %v1681_v8 = vadd.f32 %v1974_v24, %v1673_v25 }
 0x6da   :  { %v1674_v28 = vmul.f32 %v1973_v22, %v1666_v27  ;;  %2153 = vmatprep.mubr.msk.f32.mxu1 %vm78_vm0, %v1681_v8 }
 0x6dc   :  { %v1682_v29 = vadd.f32 %v1974_v24, %v1674_v28 }
 0x6de   :  { %2154 = vmatmul.mubr.msk.f32.vlgmr.msra.gmra.mxu1 %vm78_vm0, %v1682_v29 }
 0x79e   :  { %v2155_v34 = vpop.f32.mrf.mxu1 }
 0x79f   :  { %v1772_v35 = vadd.f32 %v2155_v34, %v1975_v33 }
 0x7a0   :  { %v1766_v36 = vpop.f32.mrf.mxu1 }
 0x7a1   :  { %v1767_v37 = vadd.f32 %v1975_v33, %v1766_v36  ;;  %v1778_v38 = vmul.f32 0.1, %v1772_v35  ;;  %vm1776_vm9 = vcmp.gt.f32.partialorder %v1772_v35, 0.0 }
 0x7a3   :  { %vm1775_vm10 = vcmp.gt.f32.partialorder %v1767_v37, 0.0  ;;  %v1777_v39 = vmul.f32 0.1, %v1767_v37  ;;  %v1780_v41 = vsel %vm1776_vm9, %v1772_v35, %v1778_v38 }
 0x7a5   :  { %v1779_v40 = vsel %vm1775_vm10, %v1767_v37, %v1777_v39 }
 0x7a6   :  { %2172 = vmatprep.mubr.msk.f32.mxu0 %vm1796_vm11, %v1779_v40 }
 0x7a7   :  { %2173 = vmatmul.mubr.msk.f32.vlgmr.msra.gmra.mxu0 %vm1796_vm11, %v1780_v41 }
 0x867   :  { %v2174_v43 = vpop.f32.mrf.mxu0 }
 0x868   :  { %v1875_v44 = vadd.f32 %v2174_v43, %v1978_v42 }
 0x869   :  { %v1869_v45 = vpop.f32.mrf.mxu0 }
 0x86a   :  { %v1870_v46 = vadd.f32 %v1978_v42, %v1869_v45  ;;  %v1879_v47 = vadd.f32 %v1875_v44, %v1682_v29 }
 0x86c   :  { %v1885_v48 = vsel %vm78_vm0, %v1879_v47, 0.0  ;;  %v1878_v49 = vadd.f32 %v1870_v46, %v1681_v8 }
 0x86d   :  { %1886 = vadd.xlane.f32.xlu0 %v1885_v48 }
 0x86e   :  { %v1882_v50 = vsel %vm78_vm0, %v1878_v49, 0.0 }
 0x86f   :  { %1883 = vadd.xlane.f32.xlu1 %v1882_v50 }
 0x8f6   :  { %v1887_v51 = vpop.xlane.xlu0 %1886 }
 0x8f7   :  { %v1889_v52 = vmul.f32 0.03125, %v1887_v51 }
 0x8f8   :  { %v1884_v53 = vpop.xlane.xlu1 %1883 }
 0x8f9   :  { %v1891_v54 = vsub.f32 %v1879_v47, %v1889_v52  ;;  %v1888_v55 = vmul.f32 0.03125, %v1884_v53 }
 0x8fb   :  { %v1890_v56 = vsub.f32 %v1878_v49, %v1888_v55  ;;  %v1893_v57 = vmul.f32 %v1891_v54, %v1891_v54 }
 0x8fd   :  { %v1897_v58 = vsel %vm78_vm0, %v1893_v57, 0.0  ;;  %v1892_v59 = vmul.f32 %v1890_v56, %v1890_v56 }
 0x8fe   :  { %1898 = vadd.xlane.f32.xlu0 %v1897_v58 }
 0x8ff   :  { %v1894_v60 = vsel %vm78_vm0, %v1892_v59, 0.0 }
 0x900   :  { %1895 = vadd.xlane.f32.xlu1 %v1894_v60 }
 0x987   :  { %v1899_v61 = vpop.xlane.xlu0 %1898 }
 0x988   :  { %v1901_v62 = vmul.f32 0.03125, %v1899_v61 }
 0x989   :  { %v1896_v7 = vpop.xlane.xlu1 %1895 }
 0x98a   :  { %v1903_v63 = vadd.f32 1e-06, %v1901_v62  ;;  %v1900_v0 = vmul.f32 0.03125, %v1896_v7 }
 0x98c   :  { %2232 = vrsqrt.f32 %v1903_v63  ;;  %v1902_v1 = vadd.f32 1e-06, %v1900_v0 }
 0x98e   :  { %2234 = vrsqrt.f32 %v1902_v1 }
 0x999   :  { %v2233_v3 = vpop.eup %2232 }
 0x99a   :  { %v1907_v2 = vmul.f32 %v2233_v3, %v1891_v54 }
 0x99b   :  { %v2235_v4 = vpop.eup %2234 }
 0x99c   :  { %v1906_v10 = vmul.f32 %v2235_v4, %v1890_v56  ;;  %v1915_v11 = vmul.f32 %v1981_v5, %v1907_v2 }
 0x99e   :  { %v1914_v12 = vmul.f32 %v1981_v5, %v1906_v10  ;;  %v1923_v13 = vadd.f32 %v1982_v9, %v1915_v11 }
 0x9a0   :  { %v1922_v14 = vadd.f32 %v1982_v9, %v1914_v12  ;;  %1925 = vst.msk [vmem:[#allocation8 + $0x8] sm:$0xff] %vm78_vm0, %v1923_v13 }
 0x9a2   :  { %1924 = vst.msk [vmem:[#allocation8] sm:$0xff] %vm78_vm0, %v1922_v14 }
 0x9a3   :  { %2287 = shalt.err (!%p2284_p0)
}
 0x9a4   :  { %1937 = dma.vmem_to_hbm [thread:$0]  %s1932_s23, 256, %s2681_s13, [#allocation5], %s2303_s28, %s2303_s28, %s2304_s29  }
 0x9a5   :  { %2300 = dma.done.wait [#allocation5], 256  }
 0x9a6   :  { %2301 = vsyncadd [#allocation5], 4294967040 }
 0x9a7   :  { %1941 = vsyncpa [#allocation4], 1 }
 0x9a8   :  { %1942 = vsyncpa [#allocation7], 1 }
 0x9a9   :  { %1943 = vsyncpa [#allocation5], 1 }

</bundles_post_ra>
